<compile_context>
chip_gen: v7x
topology: tpu7x:2x2x1
jax: 0.10.0
libtpu: 0.0.40
codegen_flags: <defaults>
</compile_context>

<pallas_src>
import jax
import jax.numpy as jnp
from jax import lax
from jax.experimental import pallas as pl
from jax.experimental.pallas import tpu as pltpu


def _softplus(x):
    # numerically stable Softplus (matches torch.nn.Softplus, beta=1)
    return jnp.maximum(x, 0.0) + jnp.log(1.0 + jnp.exp(-jnp.abs(x)))


def _round_up(x, m):
    return ((x + m - 1) // m) * m


def megnet_graph_conv(src, dst, edge_feat, node_feat, graph_attr, params,
                      *, edge_tile=128):
    """MEGNet graph convolution (single graph).

    Gathers / padding / bias folding are plain-JAX glue; all matmuls, softplus,
    the scatter-mean and the global means run in one Pallas kernel gridded over
    edge tiles.
    """
    f32, bf16 = jnp.float32, jnp.bfloat16

    (we1, be1, we2, be2,
     wn1, bn1, wn2, bn2,
     wa1, ba1, wa2, ba2) = params

    N, dv = node_feat.shape
    E, de = edge_feat.shape
    du = graph_attr.shape[1]
    H = we1.shape[1]
    OUT = we2.shape[1]

    # ---- padded sizes (lane-dense 128-wide activations) ----
    P = _round_up(max(H, OUT), 128)           # padded hidden / output width
    KE = 2 * dv + de                          # edge-MLP input width (u folded out)
    KE_P = _round_up(KE, 16)                  # bf16 native sublane tile = 16
    DV_P = _round_up(dv, 16)
    NS = _round_up(N + 1, 8)                  # scatter rows: N nodes + 1 esum row

    if E <= edge_tile:
        TE = _round_up(E, 16)                 # single tile: block == full array
    else:
        TE = _round_up(edge_tile, 128)        # multi-tile: keep (8,128) legality
    E_PAD = _round_up(E, TE)
    n_tiles = E_PAD // TE

    # ---- activations (wrapper-side gather + concat, then bf16) ----
    nf32 = node_feat.astype(f32)
    edge_in = jnp.concatenate(
        [nf32[src], nf32[dst], edge_feat.astype(f32)], axis=1)            # [E, KE]
    edge_in = jnp.pad(edge_in, ((0, E_PAD - E), (0, KE_P - KE))).astype(bf16)

    v_in = jnp.pad(nf32, ((0, 0), (0, DV_P - dv))).astype(bf16)           # [N, DV_P]

    # padded edges get dst = -1: they match no scatter row and no "valid" row
    dst_ids = jnp.full((1, E_PAD), -1, dtype=jnp.int32)
    dst_ids = dst_ids.at[0, :E].set(dst.astype(jnp.int32))

    # ---- fold the constant graph-attr contributions into layer-1 biases ----
    u = graph_attr.astype(f32)                                            # [1, du]
    we1_ve, we1_u = we1[:KE], we1[KE:]
    be1_eff = be1 + u @ we1_u
    wn1_v, wn1_e, wn1_u = wn1[:dv], wn1[dv:dv + OUT], wn1[dv + OUT:]
    bn1_eff = bn1 + u @ wn1_u
    wa1_u, wa1_e, wa1_v = wa1[:du], wa1[du:du + OUT], wa1[du + OUT:]
    ba1_eff = ba1 + u @ wa1_u

    # ---- one weight slab [*, P] bf16 (zero padding keeps the math exact) ----
    def padw(w, rows, cols):
        return jnp.pad(w.astype(f32),
                       ((0, rows - w.shape[0]), (0, cols - w.shape[1])))

    w_blocks = [
        padw(we1_ve, KE_P, P),                                       # edge layer 1
        padw(we2, P, P),                                             # edge layer 2
        padw(wn1_v, DV_P, P),                                        # node layer 1 (v)
        padw(wn1_e, P, P),                                           # node layer 1 (ve)
        padw(wn2, P, P),                                             # node layer 2
        jnp.concatenate([padw(wa1_e, P, P), padw(wa1_v, P, P)], 0),  # attr layer 1
        padw(wa2, P, P),                                             # attr layer 2
    ]
    w_slab = jnp.concatenate(w_blocks, axis=0).astype(bf16)
    OFF_WE1 = 0
    OFF_WE2 = OFF_WE1 + KE_P
    OFF_WN1V = OFF_WE2 + P
    OFF_WN1E = OFF_WN1V + DV_P
    OFF_WN2 = OFF_WN1E + P
    OFF_WA1 = OFF_WN2 + P
    OFF_WA2 = OFF_WA1 + 2 * P
    W_ROWS = OFF_WA2 + P

    # ---- one bias slab [6, P] f32 ----
    def padb(b):
        return jnp.pad(b.astype(f32), ((0, 0), (0, P - b.shape[1])))

    b_slab = jnp.concatenate(
        [padb(be1_eff), padb(be2), padb(bn1_eff),
         padb(bn2), padb(ba1_eff), padb(ba2)], axis=0)                    # [6, P]

    inv_E = 1.0 / E
    inv_N = 1.0 / N

    def kernel(edge_in_ref, v_ref, dst_ref, w_ref, b_ref,
               e_out_ref, v_out_ref, u_out_ref,
               ve_acc, deg_acc):
        i = pl.program_id(0)

        @pl.when(i == 0)
        def _init():
            ve_acc[...] = jnp.zeros_like(ve_acc)
            deg_acc[...] = jnp.zeros_like(deg_acc)

        b = b_ref[...]                                                    # [6, P] f32

        # ---- edge MLP on this tile (bf16 MXU operands, f32 accumulate) ----
        x = edge_in_ref[...]                                              # [TE, KE_P]
        h_e = _softplus(
            jnp.dot(x, w_ref[OFF_WE1:OFF_WE1 + KE_P, :],
                    preferred_element_type=jnp.float32) + b[0:1, :])
        e_out = _softplus(
            jnp.dot(h_e.astype(jnp.bfloat16), w_ref[OFF_WE2:OFF_WE2 + P, :],
                    preferred_element_type=jnp.float32) + b[1:2, :])
        e_out_ref[...] = e_out

        # ---- scatter + global-sum accumulation in ONE MXU matmul ----
        # rows 0..N-1 : 0/1 one-hot of dst (padded edges have dst = -1 -> no hit)
        # row  N      : 1 for every valid edge -> accumulates the global edge sum
        d = dst_ref[...]                                                  # [1, TE]
        row_ids = lax.broadcasted_iota(jnp.int32, (NS, TE), 0)
        scatter = ((row_ids == d) |
                   ((row_ids == N) & (d >= 0))).astype(jnp.float32)       # [NS, TE]
        deg_acc[...] += jnp.sum(scatter, axis=1, keepdims=True)           # [NS, 1]
        ve_acc[...] += jnp.dot(scatter.astype(jnp.bfloat16),
                               e_out.astype(jnp.bfloat16),
                               preferred_element_type=jnp.float32)        # [NS, P]

        # ---- last tile: node MLP + graph-attr MLP ----
        @pl.when(i == pl.num_programs(0) - 1)
        def _finalize():
            acc = ve_acc[...]                                             # [NS, P]
            deg = deg_acc[...]                                            # [NS, 1]
            inv_deg = 1.0 / jnp.maximum(deg[:N], 1.0)                     # exact, [N,1]
            ve = acc[:N] * inv_deg                                        # [N, P] f32

            z_n = (jnp.dot(v_ref[...], w_ref[OFF_WN1V:OFF_WN1V + DV_P, :],
                           preferred_element_type=jnp.float32)
                   + jnp.dot(ve.astype(jnp.bfloat16),
                             w_ref[OFF_WN1E:OFF_WN1E + P, :],
                             preferred_element_type=jnp.float32)
                   + b[2:3, :])
            h_n = _softplus(z_n)
            v_out = _softplus(
                jnp.dot(h_n.astype(jnp.bfloat16), w_ref[OFF_WN2:OFF_WN2 + P, :],
                        preferred_element_type=jnp.float32) + b[3:4, :])
            v_out_ref[...] = v_out

            ue = acc[N:N + 1, :] * inv_E                                  # [1, P]
            uv = jnp.sum(v_out, axis=0, keepdims=True) * inv_N            # [1, P]
            attr_in = jnp.concatenate([ue, uv], axis=1)                   # [1, 2P]
            h_a = _softplus(
                jnp.dot(attr_in.astype(jnp.bfloat16),
                        w_ref[OFF_WA1:OFF_WA1 + 2 * P, :],
                        preferred_element_type=jnp.float32) + b[4:5, :])
            u_out_ref[...] = _softplus(
                jnp.dot(h_a.astype(jnp.bfloat16), w_ref[OFF_WA2:OFF_WA2 + P, :],
                        preferred_element_type=jnp.float32) + b[5:6, :])

    # ---- pallas_call plumbing ----
    in_specs = [
        pl.BlockSpec((TE, KE_P), lambda i: (i, 0)),      # edge activations (tiled)
        pl.BlockSpec((N, DV_P), lambda i: (0, 0)),       # node features   (resident)
        pl.BlockSpec((1, TE), lambda i: (0, i)),         # dst ids         (tiled)
        pl.BlockSpec((W_ROWS, P), lambda i: (0, 0)),     # weight slab     (resident)
        pl.BlockSpec((6, P), lambda i: (0, 0)),          # bias slab       (resident)
    ]
    out_specs = (
        pl.BlockSpec((TE, P), lambda i: (i, 0)),
        pl.BlockSpec((N, P), lambda i: (0, 0)),
        pl.BlockSpec((1, P), lambda i: (0, 0)),
    )
    out_shape = (
        jax.ShapeDtypeStruct((E_PAD, P), f32),
        jax.ShapeDtypeStruct((N, P), f32),
        jax.ShapeDtypeStruct((1, P), f32),
    )
    scratch_shapes = [
        pltpu.VMEM((NS, P), jnp.float32),    # rows 0..N-1: ve sums, row N: edge sum
        pltpu.VMEM((NS, 1), jnp.float32),    # in-degree accumulator
    ]

    # VMEM budget: double-buffered tiled operands + resident slabs + scratch.
    tiled_bytes = TE * KE_P * 2 + TE * 4 + TE * P * 4
    resident_bytes = (N * DV_P * 2 + W_ROWS * P * 2 + 6 * P * 4
                      + N * P * 4 + P * 4)
    scratch_bytes = (NS * P + NS) * 4
    vmem_limit = int(min(2 * tiled_bytes + resident_bytes + scratch_bytes
                         + (16 << 20), 120 << 20))

    flops = 2 * (E_PAD * KE_P * P + E_PAD * P * P + NS * E_PAD * P
                 + N * DV_P * P + 2 * N * P * P + 3 * P * P)
    transcendentals = 4 * (E_PAD * P + N * P + P)        # exp+log per softplus layer
    bytes_accessed = (E_PAD * KE_P * 2 + E_PAD * 4 + N * DV_P * 2
                      + W_ROWS * P * 2 + 6 * P * 4
                      + (E_PAD + N + 1) * P * 4)

    e_out, v_out, u_out = pl.pallas_call(
        kernel,
        grid=(n_tiles,),
        in_specs=in_specs,
        out_specs=out_specs,
        out_shape=out_shape,
        scratch_shapes=scratch_shapes,
        compiler_params=pltpu.CompilerParams(
            dimension_semantics=("arbitrary",),          # edge axis carries accumulators
            vmem_limit_bytes=vmem_limit),
        cost_estimate=pl.CostEstimate(
            flops=flops, transcendentals=transcendentals,
            bytes_accessed=bytes_accessed),
    )(edge_in, v_in, dst_ids, w_slab, b_slab)

    # strip row / lane padding
    return e_out[:E, :OUT], v_out[:, :OUT], u_out[:, :OUT]


def reference(src, dst, edge_feat, node_feat, graph_attr, params):
    """Pure-JAX f32 reference of the same forward pass (for validation)."""
    (we1, be1, we2, be2,
     wn1, bn1, wn2, bn2,
     wa1, ba1, wa2, ba2) = params
    N = node_feat.shape[0]

    def sp(x):
        return jax.nn.softplus(x)

    u_nodes = jnp.broadcast_to(graph_attr, (N, graph_attr.shape[1]))
    edge_in = jnp.concatenate(
        [node_feat[src], node_feat[dst], edge_feat, u_nodes[src]], axis=1)
    e_out = sp(sp(edge_in @ we1 + be1) @ we2 + be2)

    one_hot = (jnp.arange(N)[:, None] == dst[None, :]).astype(jnp.float32)
    deg = jnp.sum(one_hot, axis=1, keepdims=True)
    ve = (one_hot @ e_out) / jnp.maximum(deg, 1.0)

    node_in = jnp.concatenate([node_feat, ve, u_nodes], axis=1)
    v_out = sp(sp(node_in @ wn1 + bn1) @ wn2 + bn2)

    ue = jnp.mean(e_out, axis=0, keepdims=True)
    uv = jnp.mean(v_out, axis=0, keepdims=True)
    attr_in = jnp.concatenate([graph_attr, ue, uv], axis=1)
    u_out = sp(sp(attr_in @ wa1 + ba1) @ wa2 + ba2)
    return e_out, v_out, u_out


def init_params(key, dv, de, du, hidden, out):
    """Deterministic synthetic weights with the shapes the module implies."""
    ks = jax.random.split(key, 12)
    e_in = 2 * dv + de + du
    n_in = dv + out + du
    a_in = du + out + out

    def lin(k, fan_in, fan_out):
        return jax.random.normal(k, (fan_in, fan_out), jnp.float32) * 0.1

    we1 = lin(ks[0], e_in, hidden); be1 = jax.random.normal(ks[1], (1, hidden)) * 0.1
    we2 = lin(ks[2], hidden, out);  be2 = jax.random.normal(ks[3], (1, out)) * 0.1
    wn1 = lin(ks[4], n_in, hidden); bn1 = jax.random.normal(ks[5], (1, hidden)) * 0.1
    wn2 = lin(ks[6], hidden, out);  bn2 = jax.random.normal(ks[7], (1, out)) * 0.1
    wa1 = lin(ks[8], a_in, hidden); ba1 = jax.random.normal(ks[9], (1, hidden)) * 0.1
    wa2 = lin(ks[10], hidden, out); ba2 = jax.random.normal(ks[11], (1, out)) * 0.1
    return (we1, be1, we2, be2, wn1, bn1, wn2, bn2, wa1, ba1, wa2, ba2)


if __name__ == "__main__":
    key = jax.random.PRNGKey(0)
    k_graph, k_e, k_v, k_u, k_p = jax.random.split(key, 5)

    N = 32      # nodes
    E = 256     # edges  (2 edge tiles of 128 -> exercises the accumulator grid)
    DV = 32     # node feature dim
    DE = 32     # edge feature dim
    DU = 32     # graph-attr dim
    H = 32      # MLP hidden dim
    OUT = 32    # MLP output dim

    ks, kd = jax.random.split(k_graph)
    src = jax.random.randint(ks, (E,), 0, N)
    dst = jax.random.randint(kd, (E,), 0, N)

    edge_feat = jax.random.normal(k_e, (E, DE), jnp.float32)
    node_feat = jax.random.normal(k_v, (N, DV), jnp.float32)
    graph_attr = jax.random.normal(k_u, (1, DU), jnp.float32)

    params = init_params(k_p, DV, DE, DU, H, OUT)

    e_out, v_out, u_out = megnet_graph_conv(
        src, dst, edge_feat, node_feat, graph_attr, params, edge_tile=128)
    jax.block_until_ready((e_out, v_out, u_out))

    e_ref, v_ref, u_ref = reference(
        src, dst, edge_feat, node_feat, graph_attr, params)

    assert e_out.shape == (E, OUT) and v_out.shape == (N, OUT) and u_out.shape == (1, OUT)
    # bf16 MXU operands with f32 accumulation -> compare at bf16-level tolerance
    assert jnp.allclose(e_out, e_ref, atol=1e-2, rtol=1e-2)
    assert jnp.allclose(v_out, v_ref, atol=1e-2, rtol=1e-2)
    assert jnp.allclose(u_out, u_ref, atol=1e-2, rtol=1e-2)

    print("KERNEL_OK")
</pallas_src>

<mosaic_0001>
module attributes {stable_mosaic.version = 11 : i64} {
  func.func @kernel(%arg0: i32, %arg1: memref<128x96xbf16, #tpu.memory_space<vmem>>, %arg2: memref<32x32xbf16, #tpu.memory_space<vmem>>, %arg3: memref<1x128xi32, #tpu.memory_space<vmem>>, %arg4: memref<896x128xbf16, #tpu.memory_space<vmem>>, %arg5: memref<6x128xf32, #tpu.memory_space<vmem>>, %arg6: memref<128x128xf32, #tpu.memory_space<vmem>>, %arg7: memref<32x128xf32, #tpu.memory_space<vmem>>, %arg8: memref<1x128xf32, #tpu.memory_space<vmem>>, %arg9: memref<40x128xf32, #tpu.memory_space<vmem>>, %arg10: memref<40x1xf32, #tpu.memory_space<vmem>>) attributes {dimension_semantics = [#tpu.dimension_semantics<arbitrary>], iteration_bounds = array<i64: 2>, scalar_prefetch = 0 : i64, scratch_operands = 2 : i64, tpu.core_type = #tpu.core_type<tc>, window_params = [{transform_indices = @transform_0, window_bounds = array<i64: 128, 96>}, {pipeline_mode = #tpu.pipeline_mode<synchronous>, transform_indices = @transform_1, window_bounds = array<i64: 32, 32>}, {transform_indices = @transform_2, window_bounds = array<i64: 1, 128>}, {pipeline_mode = #tpu.pipeline_mode<synchronous>, transform_indices = @transform_3, window_bounds = array<i64: 896, 128>}, {pipeline_mode = #tpu.pipeline_mode<synchronous>, transform_indices = @transform_4, window_bounds = array<i64: 6, 128>}, {transform_indices = @transform_5, window_bounds = array<i64: 128, 128>}, {pipeline_mode = #tpu.pipeline_mode<synchronous>, transform_indices = @transform_6, window_bounds = array<i64: 32, 128>}, {pipeline_mode = #tpu.pipeline_mode<synchronous>, transform_indices = @transform_7, window_bounds = array<i64: 1, 128>}]} {
    %c0_i32 = arith.constant 0 : i32
    %0 = arith.cmpi eq, %arg0, %c0_i32 : i32
    %1 = arith.extui %0 : i1 to i32
    %c0_i32_0 = arith.constant 0 : i32
    %2 = arith.cmpi ne, %1, %c0_i32_0 : i32
    scf.if %2 {
      %cst_30 = arith.constant 0.000000e+00 : f32
      %64 = vector.broadcast %cst_30 : f32 to vector<40x128xf32>
      %c0_31 = arith.constant 0 : index
      %c0_32 = arith.constant 0 : index
      %65 = vector.load %arg9[%c0_31, %c0_32] : memref<40x128xf32, #tpu.memory_space<vmem>>, vector<40x128xf32>
      tpu.vector_store %arg9[%c0_31, %c0_32], %64 {strides = array<i32>} : memref<40x128xf32, #tpu.memory_space<vmem>>, vector<40x128xf32>,
      %cst_33 = arith.constant 0.000000e+00 : f32
      %66 = vector.broadcast %cst_33 : f32 to vector<40x1xf32>
      %c0_34 = arith.constant 0 : index
      %c0_35 = arith.constant 0 : index
      %67 = vector.load %arg10[%c0_34, %c0_35] : memref<40x1xf32, #tpu.memory_space<vmem>>, vector<40x1xf32>
      tpu.vector_store %arg10[%c0_34, %c0_35], %66 {strides = array<i32>} : memref<40x1xf32, #tpu.memory_space<vmem>>, vector<40x1xf32>,
    } else {
    }
    %c0 = arith.constant 0 : index
    %c0_1 = arith.constant 0 : index
    %3 = vector.load %arg5[%c0, %c0_1] : memref<6x128xf32, #tpu.memory_space<vmem>>, vector<6x128xf32>
    %c0_2 = arith.constant 0 : index
    %c0_3 = arith.constant 0 : index
    %4 = vector.load %arg1[%c0_2, %c0_3] : memref<128x96xbf16, #tpu.memory_space<vmem>>, vector<128x96xbf16>
    %c0_4 = arith.constant 0 : index
    %c0_5 = arith.constant 0 : index
    %5 = vector.load %arg4[%c0_4, %c0_5] : memref<896x128xbf16, #tpu.memory_space<vmem>>, vector<96x128xbf16>
    %cst = arith.constant dense<0.000000e+00> : vector<128x128xf32>
    %6 = tpu.matmul %4, %5, %cst {dimension_numbers = #tpu.dot_dimension_numbers<[1], [0], [0], [1], [0, 0, 1, 1], [], []>} : vector<128x96xbf16>, vector<96x128xbf16>, vector<128x128xf32> -> vector<128x128xf32>
    %7 = vector.extract_strided_slice %3 {offsets = [0, 0], sizes = [1, 128], strides = [1, 1]} : vector<6x128xf32> to vector<1x128xf32>
    %8 = vector.broadcast %7 : vector<1x128xf32> to vector<128x128xf32>
    %9 = arith.addf %6, %8 : vector<128x128xf32>
    %cst_6 = arith.constant 0.000000e+00 : f32
    %10 = vector.broadcast %cst_6 : f32 to vector<128x128xf32>
    %11 = arith.maximumf %9, %10 : vector<128x128xf32>
    %12 = math.absf %9 : vector<128x128xf32>
    %cst_7 = arith.constant 0.000000e+00 : f32
    %13 = vector.broadcast %cst_7 : f32 to vector<128x128xf32>
    %14 = arith.subf %13, %12 : vector<128x128xf32>
    %15 = math.exp %14 : vector<128x128xf32>
    %cst_8 = arith.constant 1.000000e+00 : f32
    %16 = vector.broadcast %cst_8 : f32 to vector<128x128xf32>
    %17 = arith.addf %16, %15 : vector<128x128xf32>
    %18 = math.log %17 : vector<128x128xf32>
    %19 = arith.addf %11, %18 : vector<128x128xf32>
    %20 = arith.truncf %19 : vector<128x128xf32> to vector<128x128xbf16>
    %c96 = arith.constant 96 : index
    %c0_9 = arith.constant 0 : index
    %21 = vector.load %arg4[%c96, %c0_9] : memref<896x128xbf16, #tpu.memory_space<vmem>>, vector<128x128xbf16>
    %cst_10 = arith.constant dense<0.000000e+00> : vector<128x128xf32>
    %22 = tpu.matmul %20, %21, %cst_10 {dimension_numbers = #tpu.dot_dimension_numbers<[1], [0], [0], [1], [0, 0, 1, 1], [], []>} : vector<128x128xbf16>, vector<128x128xbf16>, vector<128x128xf32> -> vector<128x128xf32>
    %23 = vector.extract_strided_slice %3 {offsets = [1, 0], sizes = [1, 128], strides = [1, 1]} : vector<6x128xf32> to vector<1x128xf32>
    %24 = vector.broadcast %23 : vector<1x128xf32> to vector<128x128xf32>
    %25 = arith.addf %22, %24 : vector<128x128xf32>
    %cst_11 = arith.constant 0.000000e+00 : f32
    %26 = vector.broadcast %cst_11 : f32 to vector<128x128xf32>
    %27 = arith.maximumf %25, %26 : vector<128x128xf32>
    %28 = math.absf %25 : vector<128x128xf32>
    %cst_12 = arith.constant 0.000000e+00 : f32
    %29 = vector.broadcast %cst_12 : f32 to vector<128x128xf32>
    %30 = arith.subf %29, %28 : vector<128x128xf32>
    %31 = math.exp %30 : vector<128x128xf32>
    %cst_13 = arith.constant 1.000000e+00 : f32
    %32 = vector.broadcast %cst_13 : f32 to vector<128x128xf32>
    %33 = arith.addf %32, %31 : vector<128x128xf32>
    %34 = math.log %33 : vector<128x128xf32>
    %35 = arith.addf %27, %34 : vector<128x128xf32>
    %c0_14 = arith.constant 0 : index
    %c0_15 = arith.constant 0 : index
    %36 = vector.load %arg6[%c0_14, %c0_15] : memref<128x128xf32, #tpu.memory_space<vmem>>, vector<128x128xf32>
    tpu.vector_store %arg6[%c0_14, %c0_15], %35 {strides = array<i32>} : memref<128x128xf32, #tpu.memory_space<vmem>>, vector<128x128xf32>,
    %c0_16 = arith.constant 0 : index
    %c0_17 = arith.constant 0 : index
    %37 = vector.load %arg3[%c0_16, %c0_17] : memref<1x128xi32, #tpu.memory_space<vmem>>, vector<1x128xi32>
    %38 = tpu.iota {dimensions = array<i32: 0>} : vector<40x128xi32>
    %39 = vector.broadcast %37 : vector<1x128xi32> to vector<40x128xi32>
    %40 = arith.cmpi eq, %38, %39 : vector<40x128xi32>
    %c32_i32 = arith.constant 32 : i32
    %41 = vector.broadcast %c32_i32 : i32 to vector<40x128xi32>
    %42 = arith.cmpi eq, %38, %41 : vector<40x128xi32>
    %c0_i32_18 = arith.constant 0 : i32
    %43 = vector.broadcast %c0_i32_18 : i32 to vector<1x128xi32>
    %44 = arith.cmpi sge, %37, %43 : vector<1x128xi32>
    %45 = vector.broadcast %44 : vector<1x128xi1> to vector<40x128xi1>
    %46 = arith.andi %42, %45 : vector<40x128xi1>
    %47 = arith.ori %40, %46 : vector<40x128xi1>
    %48 = arith.extui %47 : vector<40x128xi1> to vector<40x128xi32>
    %49 = arith.sitofp %48 : vector<40x128xi32> to vector<40x128xf32>
    %c0_19 = arith.constant 0 : index
    %c0_20 = arith.constant 0 : index
    %50 = vector.load %arg10[%c0_19, %c0_20] : memref<40x1xf32, #tpu.memory_space<vmem>>, vector<40x1xf32>
    %cst_21 = arith.constant dense<0.000000e+00> : vector<40xf32>
    %51 = vector.multi_reduction <add>, %49, %cst_21 [1] : vector<40x128xf32> to vector<40xf32>
    %52 = vector.shape_cast %51 : vector<40xf32> to vector<40x1xf32>
    %53 = arith.addf %50, %52 : vector<40x1xf32>
    %c0_22 = arith.constant 0 : index
    %c0_23 = arith.constant 0 : index
    %54 = vector.load %arg10[%c0_22, %c0_23] : memref<40x1xf32, #tpu.memory_space<vmem>>, vector<40x1xf32>
    tpu.vector_store %arg10[%c0_22, %c0_23], %53 {strides = array<i32>} : memref<40x1xf32, #tpu.memory_space<vmem>>, vector<40x1xf32>,
    %c0_24 = arith.constant 0 : index
    %c0_25 = arith.constant 0 : index
    %55 = vector.load %arg9[%c0_24, %c0_25] : memref<40x128xf32, #tpu.memory_space<vmem>>, vector<40x128xf32>
    %56 = arith.truncf %49 : vector<40x128xf32> to vector<40x128xbf16>
    %57 = arith.truncf %35 : vector<128x128xf32> to vector<128x128xbf16>
    %cst_26 = arith.constant dense<0.000000e+00> : vector<40x128xf32>
    %58 = tpu.matmul %56, %57, %cst_26 {dimension_numbers = #tpu.dot_dimension_numbers<[1], [0], [0], [1], [0, 0, 1, 1], [], []>} : vector<40x128xbf16>, vector<128x128xbf16>, vector<40x128xf32> -> vector<40x128xf32>
    %59 = arith.addf %55, %58 : vector<40x128xf32>
    %c0_27 = arith.constant 0 : index
    %c0_28 = arith.constant 0 : index
    %60 = vector.load %arg9[%c0_27, %c0_28] : memref<40x128xf32, #tpu.memory_space<vmem>>, vector<40x128xf32>
    tpu.vector_store %arg9[%c0_27, %c0_28], %59 {strides = array<i32>} : memref<40x128xf32, #tpu.memory_space<vmem>>, vector<40x128xf32>,
    %c1_i32 = arith.constant 1 : i32
    %61 = arith.cmpi eq, %arg0, %c1_i32 : i32
    %62 = arith.extui %61 : i1 to i32
    %c0_i32_29 = arith.constant 0 : i32
    %63 = arith.cmpi ne, %62, %c0_i32_29 : i32
    scf.if %63 {
      %c0_30 = arith.constant 0 : index
      %c0_31 = arith.constant 0 : index
      %64 = vector.load %arg9[%c0_30, %c0_31] : memref<40x128xf32, #tpu.memory_space<vmem>>, vector<40x128xf32>
      %c0_32 = arith.constant 0 : index
      %c0_33 = arith.constant 0 : index
      %65 = vector.load %arg10[%c0_32, %c0_33] : memref<40x1xf32, #tpu.memory_space<vmem>>, vector<40x1xf32>
      %66 = vector.extract_strided_slice %65 {offsets = [0, 0], sizes = [32, 1], strides = [1, 1]} : vector<40x1xf32> to vector<32x1xf32>
      %cst_34 = arith.constant 1.000000e+00 : f32
      %67 = vector.broadcast %cst_34 : f32 to vector<32x1xf32>
      %68 = arith.maximumf %66, %67 : vector<32x1xf32>
      %cst_35 = arith.constant 1.000000e+00 : f32
      %69 = vector.broadcast %cst_35 : f32 to vector<32x1xf32>
      %70 = arith.divf %69, %68 : vector<32x1xf32>
      %71 = vector.extract_strided_slice %64 {offsets = [0, 0], sizes = [32, 128], strides = [1, 1]} : vector<40x128xf32> to vector<32x128xf32>
      %72 = vector.broadcast %70 : vector<32x1xf32> to vector<32x128xf32>
      %73 = arith.mulf %71, %72 : vector<32x128xf32>
      %c0_36 = arith.constant 0 : index
      %c0_37 = arith.constant 0 : index
      %74 = vector.load %arg2[%c0_36, %c0_37] : memref<32x32xbf16, #tpu.memory_space<vmem>>, vector<32x32xbf16>
      %c224 = arith.constant 224 : index
      %c0_38 = arith.constant 0 : index
      %75 = vector.load %arg4[%c224, %c0_38] : memref<896x128xbf16, #tpu.memory_space<vmem>>, vector<32x128xbf16>
      %cst_39 = arith.constant dense<0.000000e+00> : vector<32x128xf32>
      %76 = tpu.matmul %74, %75, %cst_39 {dimension_numbers = #tpu.dot_dimension_numbers<[1], [0], [0], [1], [0, 0, 1, 1], [], []>} : vector<32x32xbf16>, vector<32x128xbf16>, vector<32x128xf32> -> vector<32x128xf32>
      %77 = arith.truncf %73 : vector<32x128xf32> to vector<32x128xbf16>
      %c256 = arith.constant 256 : index
      %c0_40 = arith.constant 0 : index
      %78 = vector.load %arg4[%c256, %c0_40] : memref<896x128xbf16, #tpu.memory_space<vmem>>, vector<128x128xbf16>
      %cst_41 = arith.constant dense<0.000000e+00> : vector<32x128xf32>
      %79 = tpu.matmul %77, %78, %cst_41 {dimension_numbers = #tpu.dot_dimension_numbers<[1], [0], [0], [1], [0, 0, 1, 1], [], []>} : vector<32x128xbf16>, vector<128x128xbf16>, vector<32x128xf32> -> vector<32x128xf32>
      %80 = arith.addf %76, %79 : vector<32x128xf32>
      %81 = vector.extract_strided_slice %3 {offsets = [2, 0], sizes = [1, 128], strides = [1, 1]} : vector<6x128xf32> to vector<1x128xf32>
      %82 = vector.broadcast %81 : vector<1x128xf32> to vector<32x128xf32>
      %83 = arith.addf %80, %82 : vector<32x128xf32>
      %cst_42 = arith.constant 0.000000e+00 : f32
      %84 = vector.broadcast %cst_42 : f32 to vector<32x128xf32>
      %85 = arith.maximumf %83, %84 : vector<32x128xf32>
      %86 = math.absf %83 : vector<32x128xf32>
      %cst_43 = arith.constant 0.000000e+00 : f32
      %87 = vector.broadcast %cst_43 : f32 to vector<32x128xf32>
      %88 = arith.subf %87, %86 : vector<32x128xf32>
      %89 = math.exp %88 : vector<32x128xf32>
      %cst_44 = arith.constant 1.000000e+00 : f32
      %90 = vector.broadcast %cst_44 : f32 to vector<32x128xf32>
      %91 = arith.addf %90, %89 : vector<32x128xf32>
      %92 = math.log %91 : vector<32x128xf32>
      %93 = arith.addf %85, %92 : vector<32x128xf32>
      %94 = arith.truncf %93 : vector<32x128xf32> to vector<32x128xbf16>
      %c384 = arith.constant 384 : index
      %c0_45 = arith.constant 0 : index
      %95 = vector.load %arg4[%c384, %c0_45] : memref<896x128xbf16, #tpu.memory_space<vmem>>, vector<128x128xbf16>
      %cst_46 = arith.constant dense<0.000000e+00> : vector<32x128xf32>
      %96 = tpu.matmul %94, %95, %cst_46 {dimension_numbers = #tpu.dot_dimension_numbers<[1], [0], [0], [1], [0, 0, 1, 1], [], []>} : vector<32x128xbf16>, vector<128x128xbf16>, vector<32x128xf32> -> vector<32x128xf32>
      %97 = vector.extract_strided_slice %3 {offsets = [3, 0], sizes = [1, 128], strides = [1, 1]} : vector<6x128xf32> to vector<1x128xf32>
      %98 = vector.broadcast %97 : vector<1x128xf32> to vector<32x128xf32>
      %99 = arith.addf %96, %98 : vector<32x128xf32>
      %cst_47 = arith.constant 0.000000e+00 : f32
      %100 = vector.broadcast %cst_47 : f32 to vector<32x128xf32>
      %101 = arith.maximumf %99, %100 : vector<32x128xf32>
      %102 = math.absf %99 : vector<32x128xf32>
      %cst_48 = arith.constant 0.000000e+00 : f32
      %103 = vector.broadcast %cst_48 : f32 to vector<32x128xf32>
      %104 = arith.subf %103, %102 : vector<32x128xf32>
      %105 = math.exp %104 : vector<32x128xf32>
      %cst_49 = arith.constant 1.000000e+00 : f32
      %106 = vector.broadcast %cst_49 : f32 to vector<32x128xf32>
      %107 = arith.addf %106, %105 : vector<32x128xf32>
      %108 = math.log %107 : vector<32x128xf32>
      %109 = arith.addf %101, %108 : vector<32x128xf32>
      %c0_50 = arith.constant 0 : index
      %c0_51 = arith.constant 0 : index
      %110 = vector.load %arg7[%c0_50, %c0_51] : memref<32x128xf32, #tpu.memory_space<vmem>>, vector<32x128xf32>
      tpu.vector_store %arg7[%c0_50, %c0_51], %109 {strides = array<i32>} : memref<32x128xf32, #tpu.memory_space<vmem>>, vector<32x128xf32>,
      %111 = vector.extract_strided_slice %64 {offsets = [32, 0], sizes = [1, 128], strides = [1, 1]} : vector<40x128xf32> to vector<1x128xf32>
      %cst_52 = arith.constant 3.906250e-03 : f32
      %112 = vector.broadcast %cst_52 : f32 to vector<1x128xf32>
      %113 = arith.mulf %111, %112 : vector<1x128xf32>
      %cst_53 = arith.constant dense<0.000000e+00> : vector<128xf32>
      %114 = vector.multi_reduction <add>, %109, %cst_53 [0] : vector<32x128xf32> to vector<128xf32>
      %115 = vector.shape_cast %114 : vector<128xf32> to vector<1x128xf32>
      %cst_54 = arith.constant 3.125000e-02 : f32
      %116 = vector.broadcast %cst_54 : f32 to vector<1x128xf32>
      %117 = arith.mulf %115, %116 : vector<1x128xf32>
      %118 = tpu.concatenate %113, %117 in 1 : vector<1x128xf32>, vector<1x128xf32> -> vector<1x256xf32>
      %119 = arith.truncf %118 : vector<1x256xf32> to vector<1x256xbf16>
      %c512 = arith.constant 512 : index
      %c0_55 = arith.constant 0 : index
      %120 = vector.load %arg4[%c512, %c0_55] : memref<896x128xbf16, #tpu.memory_space<vmem>>, vector<256x128xbf16>
      %cst_56 = arith.constant dense<0.000000e+00> : vector<1x128xf32>
      %121 = tpu.matmul %119, %120, %cst_56 {dimension_numbers = #tpu.dot_dimension_numbers<[1], [0], [0], [1], [0, 0, 1, 1], [], []>} : vector<1x256xbf16>, vector<256x128xbf16>, vector<1x128xf32> -> vector<1x128xf32>
      %122 = vector.extract_strided_slice %3 {offsets = [4, 0], sizes = [1, 128], strides = [1, 1]} : vector<6x128xf32> to vector<1x128xf32>
      %123 = arith.addf %121, %122 : vector<1x128xf32>
      %cst_57 = arith.constant 0.000000e+00 : f32
      %124 = vector.broadcast %cst_57 : f32 to vector<1x128xf32>
      %125 = arith.maximumf %123, %124 : vector<1x128xf32>
      %126 = math.absf %123 : vector<1x128xf32>
      %cst_58 = arith.constant 0.000000e+00 : f32
      %127 = vector.broadcast %cst_58 : f32 to vector<1x128xf32>
      %128 = arith.subf %127, %126 : vector<1x128xf32>
      %129 = math.exp %128 : vector<1x128xf32>
      %cst_59 = arith.constant 1.000000e+00 : f32
      %130 = vector.broadcast %cst_59 : f32 to vector<1x128xf32>
      %131 = arith.addf %130, %129 : vector<1x128xf32>
      %132 = math.log %131 : vector<1x128xf32>
      %133 = arith.addf %125, %132 : vector<1x128xf32>
      %134 = arith.truncf %133 : vector<1x128xf32> to vector<1x128xbf16>
      %c768 = arith.constant 768 : index
      %c0_60 = arith.constant 0 : index
      %135 = vector.load %arg4[%c768, %c0_60] : memref<896x128xbf16, #tpu.memory_space<vmem>>, vector<128x128xbf16>
      %cst_61 = arith.constant dense<0.000000e+00> : vector<1x128xf32>
      %136 = tpu.matmul %134, %135, %cst_61 {dimension_numbers = #tpu.dot_dimension_numbers<[1], [0], [0], [1], [0, 0, 1, 1], [], []>} : vector<1x128xbf16>, vector<128x128xbf16>, vector<1x128xf32> -> vector<1x128xf32>
      %137 = vector.extract_strided_slice %3 {offsets = [5, 0], sizes = [1, 128], strides = [1, 1]} : vector<6x128xf32> to vector<1x128xf32>
      %138 = arith.addf %136, %137 : vector<1x128xf32>
      %cst_62 = arith.constant 0.000000e+00 : f32
      %139 = vector.broadcast %cst_62 : f32 to vector<1x128xf32>
      %140 = arith.maximumf %138, %139 : vector<1x128xf32>
      %141 = math.absf %138 : vector<1x128xf32>
      %cst_63 = arith.constant 0.000000e+00 : f32
      %142 = vector.broadcast %cst_63 : f32 to vector<1x128xf32>
      %143 = arith.subf %142, %141 : vector<1x128xf32>
      %144 = math.exp %143 : vector<1x128xf32>
      %cst_64 = arith.constant 1.000000e+00 : f32
      %145 = vector.broadcast %cst_64 : f32 to vector<1x128xf32>
      %146 = arith.addf %145, %144 : vector<1x128xf32>
      %147 = math.log %146 : vector<1x128xf32>
      %148 = arith.addf %140, %147 : vector<1x128xf32>
      %c0_65 = arith.constant 0 : index
      %c0_66 = arith.constant 0 : index
      %149 = vector.load %arg8[%c0_65, %c0_66] : memref<1x128xf32, #tpu.memory_space<vmem>>, vector<1x128xf32>
      tpu.vector_store %arg8[%c0_65, %c0_66], %148 {strides = array<i32>} : memref<1x128xf32, #tpu.memory_space<vmem>>, vector<1x128xf32>,
    } else {
    }
    return
  }
  func.func @transform_0(%arg0: i32) -> (i32, i32) {
    %c0_i32 = arith.constant 0 : i32
    %c0_i32_0 = arith.constant 0 : i32
    return %arg0, %c0_i32 : i32, i32
  }
  func.func @transform_1(%arg0: i32) -> (i32, i32) {
    %c0_i32 = arith.constant 0 : i32
    %c0_i32_0 = arith.constant 0 : i32
    %c0_i32_1 = arith.constant 0 : i32
    return %c0_i32, %c0_i32_0 : i32, i32
  }
  func.func @transform_2(%arg0: i32) -> (i32, i32) {
    %c0_i32 = arith.constant 0 : i32
    %c0_i32_0 = arith.constant 0 : i32
    return %c0_i32, %arg0 : i32, i32
  }
  func.func @transform_3(%arg0: i32) -> (i32, i32) {
    %c0_i32 = arith.constant 0 : i32
    %c0_i32_0 = arith.constant 0 : i32
    %c0_i32_1 = arith.constant 0 : i32
    return %c0_i32, %c0_i32_0 : i32, i32
  }
  func.func @transform_4(%arg0: i32) -> (i32, i32) {
    %c0_i32 = arith.constant 0 : i32
    %c0_i32_0 = arith.constant 0 : i32
    %c0_i32_1 = arith.constant 0 : i32
    return %c0_i32, %c0_i32_0 : i32, i32
  }
  func.func @transform_5(%arg0: i32) -> (i32, i32) {
    %c0_i32 = arith.constant 0 : i32
    %c0_i32_0 = arith.constant 0 : i32
    return %arg0, %c0_i32 : i32, i32
  }
  func.func @transform_6(%arg0: i32) -> (i32, i32) {
    %c0_i32 = arith.constant 0 : i32
    %c0_i32_0 = arith.constant 0 : i32
    %c0_i32_1 = arith.constant 0 : i32
    return %c0_i32, %c0_i32_0 : i32, i32
  }
  func.func @transform_7(%arg0: i32) -> (i32, i32) {
    %c0_i32 = arith.constant 0 : i32
    %c0_i32_0 = arith.constant 0 : i32
    %c0_i32_1 = arith.constant 0 : i32
    return %c0_i32, %c0_i32_0 : i32, i32
  }
}

</mosaic_0001>

<bundles_post_ra>
// kernel: tpu_custom_call.1
= control target key start
LH: loop header
LB: loop body
LE: loop exit
PB: predicated region body
PF: predicated region fallthrough
CT: control target
= control target key end

     0   :  { %13 = vsyncpa [#allocation5], 0  ;;  %s3515_s0 = inlined_call_operand.vmem [shape: bf16[256,96], index: 0, kind: input, shape index: {}]   ;;  %s3516_s1 = inlined_call_operand.vmem [shape: bf16[32,32], index: 1, kind: input, shape index: {}]   ;;  %s3517_s2 = inlined_call_operand.vmem [shape: s32[1,256], index: 2, kind: input, shape index: {}]   ;;  %s3518_s3 = inlined_call_operand.hbm [shape: bf16[896,128], index: 3, kind: input, shape index: {}]   ;;  %s3519_s4 = inlined_call_operand.vmem [shape: f32[6,128], index: 4, kind: input, shape index: {}]   ;;  %s3520_s5 = inlined_call_operand.hbm [shape: f32[256,128], index: 5, kind: output, shape index: {0}]   ;;  %s3521_s6 = inlined_call_operand.hbm [shape: f32[32,128], index: 6, kind: output, shape index: {1}]   ;;  %s3522_s7 = inlined_call_operand.hbm [shape: f32[1,128], index: 7, kind: output, shape index: {2}]  }
   0x1   :  { %14 = vsyncpa [#allocation6], 0 }
   0x2   :  { %16 = vsyncpa [#allocation6 + $0x1], 0 }
   0x3   :  { %17 = vsyncpa [#allocation9], 0  ;;  %s2998_s24 = smov 0   ;;  %s3000_s25 = smov 0  }
   0x4   :  { %s3002_s26 = smov 0   ;;  %s3004_s27 = smov 0  }
   0x5 LB: > { %s3019_s28 = sadd.s32 4294967295, %s2940_s27   ;;  %s2090_s29 = sadd.s32 4294967294, %s2940_s27   ;;  %s2940_s27 = sphi %s3004_s27, %s3554_s27   ;;  %s2936_s26 = sphi %s3002_s26, %s3553_s26   ;;  %s2932_s25 = sphi %s3000_s25, %s3552_s25   ;;  %s2928_s24 = sphi %s2998_s24, %s3551_s24  }
   0x6   : > { %s3023_s30 = sadd.s32 1, %s2940_s27   ;;  %s145_s8 = sadd.s32 1, %s2936_s26 }
   0x7   : > { %s142_s9 = ssub.s32 %s2940_s27, %s3023_s30  ;;  %p155_p0 = scmp.ne.s32.totalorder %s2936_s26, %s2932_s25 }
   0x8   : > { %p143_p1 = scmp.eq.s32.totalorder %s142_s9, 0  ;;  %p3523_p2 = scmp.eq.s32.totalorder %s3019_s28, 1 }
   0x9   : > { %p161_p3 = scmp.ne.s32.totalorder %s2932_s25, %s2928_s24  ;;  %p162_p4 = scmp.eq.s32.totalorder %s2090_s29, 1 }
   0xa   : > { %s3034_s10 = scalar_select %p143_p1, %s2936_s26, %s145_s8  }
   0xb   : > { %p3038_p5 = por %p3523_p2, %p155_p0  ;;  %p3042_p6 = por %p162_p4, %p161_p3 }
   0xc   : > { %p2091_p7 = scmp.ge.s32.totalorder %s2940_s27, 1  ;;  %p211_p8 = scmp.lt.s32.totalorder %s2940_s27, 3 }
   0xd   : > { %s3527_s11 = scalar_select %p3038_p5, 1, 0 }
   0xe   : > { %s3528_s12 = scalar_select %p3042_p6, 1, 0 }
   0xf   : > { %p3524_p10 = scmp.eq.s32.totalorder %s3019_s28, 0  ;;  %p3050_p11 = pnand %p2091_p7, %p211_p8 }
  0x10   : > { %s2942_s14 = smov [#allocation4]   ;;  %s2790_s19 = scalar_lea.hbm %s3518_s3, 7168 }
  0x11   : > { %s3529_s13 = scalar_select %p3050_p11, 1, 0 }
  0x12   : > { %s226_s15 = sshll.u32 %s2942_s14, 4  ;;  %p2484_p12 = pneg %p3050_p11  ;;  %s227_s15 = int_to_ptr.vmem [resolvable:$true] %s226_s15 }
  0x13   : > { %p2791_p0 = scmp.ne.s32.totalorder %s3518_s3, %s2790_s19  ;;  %p2797_p7 = scmp.lt.u32.totalorder %s2790_s19, %s3518_s3 }
  0x14   : > { %p3058_p13 = pnand %p3524_p10, %p2484_p12 }
  0x16   : > { %p2792_p1 = pneg %p3058_p13 }
  0x18   : > { %p2793_p3 = pnand %p2792_p1, %p2791_p0 }
  0x1a   : > { %p2794_p4 = pneg %p2793_p3 }
  0x1c   : > { %p2799_p8 = pnand %p2797_p7, %p2794_p4 }
  0x1e   : > { %2802 = shalt.err (!%p2799_p8)
}
  0x1f   : > { %s2803_s29 = scalar_lea.vmem %s227_s15, 7168  ;;  %p2811_p10 = scmp.lt.s32.totalorder %s227_s15, %s227_s15 }
  0x20   : > { %p2804_p12 = scmp.ne.s32.totalorder %s227_s15, %s2803_s29  ;;  %p2812_p6 = scmp.lt.s32.totalorder %s2803_s29, %s2803_s29 }
  0x22   : > { %p2806_p2 = pnand %p2804_p12, %p2792_p1  ;;  %p2813_p5 = por %p2812_p6, %p2811_p10 }
  0x24   : > { %p2807_p9 = pneg %p2806_p2 }
  0x26   : > { %p2814_p11 = pnand %p2813_p5, %p2807_p9 }
  0x28   : > { %2817 = shalt.err (!%p2814_p11)
}
  0x29   : > { %s2943_s8 = smov 64   ;;  %s2944_s9 = smov 4  }
  0x2a   : > { %2487 = dma.hbm_to_vmem [thread:$0]  (!%p3058_p13), %s3518_s3, 7168, %s227_s15, [#allocation5], %s2943_s8, %s2943_s8, %s2944_s9  }
  0x2b   : > { %p3531_p0 = scmp.ne.s32.totalorder %s3529_s13, 0 }
  0x2c   : > { %p3532_p3 = scmp.eq.s32.totalorder (!%p3531_p0), %s3019_s28, 0 }
  0x2d   : > { %260 = sbr.rel (%p3531_p0) target bundleno = 2006 (0x7d6), region = 40 }
  0x34   : > { %2915 = dma.done.wait (%p3532_p3), [#allocation5], 7168   ;;  %p3533_p2 = pmov %p3532_p3 }
  0x35   : > { %s288_s18 = sand.u32 1, %s2932_s25   ;;  %s2097_s16 = sshll.u32 %s3019_s28, 4 }
  0x36   : > { %2917 = vsyncadd (%p3533_p2), [#allocation5], 4294960128  ;;  %s2096_s19 = sshll.u32 %s288_s18, 7  ;;  %p296_p5 = scmp.lt.s32.totalorder %s2097_s16, 31 }
  0x37   : > { %p301_p6 = scmp.lt.s32.totalorder %s3019_s28, 1  ;;  %s3101_s9 = scalar_lea.vmem [#allocation7], %s2096_s19 }
  0x38   : > { %s3556_s16 = smov (!%p296_p5, %s2097_s16), 31  ;;  %p3534_p9 = scmp.ne.s32.totalorder %s3019_s28, 0 }
  0x39   : > { %s3090_s13 = scalar_select %p301_p6, %s3019_s28, 1 }
  0x3a   : > { %s2098_s15 = sshll.u32 %s3556_s16, 2  ;;  %309 = sbr.rel (%p3534_p9) target bundleno = 65 (0x41), region = 48  ;;  %vm315_vm0 = vcmask (!%p3534_p9), 7168   ;;  %v2945_v0 = vmov (!%p3534_p9), 0.0  }
  0x3b   : > { %s3095_s22 = scalar_lea.vmem %s3515_s0, %s2098_s15  ;;  %s303_s8 = scalar_lea.vmem %s3517_s2, %s3090_s13  ;;  %310 = vst [vmem:[#allocation2] sm:$0xff] (!%p3534_p9), %v2945_v0  ;;  %311 = vst [vmem:[#allocation2 + $0x8] sm:$0xff] (!%p3534_p9), %v2945_v0 }
  0x3c   : > { %312 = vst [vmem:[#allocation2 + $0x10] sm:$0xff] (!%p3534_p9), %v2945_v0  ;;  %313 = vst [vmem:[#allocation2 + $0x18] sm:$0xff] (!%p3534_p9), %v2945_v0 }
  0x3d   : > { %314 = vst [vmem:[#allocation2 + $0x20] sm:$0xff] (!%p3534_p9), %v2945_v0  ;;  %316 = vst.msk [vmem:[#allocation3] sm:$0xff] (!%p3534_p9), %vm315_vm0, %v2945_v0 }
  0x3e   : > { %317 = vst.msk [vmem:[#allocation3 + $0x8] sm:$0xff] (!%p3534_p9), %vm315_vm0, %v2945_v0  ;;  %318 = vst.msk [vmem:[#allocation3 + $0x10] sm:$0xff] (!%p3534_p9), %vm315_vm0, %v2945_v0 }
  0x3f   : > { %319 = vst.msk [vmem:[#allocation3 + $0x18] sm:$0xff] (!%p3534_p9), %vm315_vm0, %v2945_v0  ;;  %320 = vst.msk [vmem:[#allocation3 + $0x20] sm:$0xff] (!%p3534_p9), %vm315_vm0, %v2945_v0 }
  0x41 PF: > { %v2546_v1 = vld [vmem:[#allocation4] sm:$0xff]   ;;  %v2547_v2 = vld [vmem:[#allocation4 + $0x8] sm:$0xff]   ;;  %v2548_v3 = vld [vmem:[#allocation4 + $0x10] sm:$0xff]   ;;  %vm430_vm1 = vcmask 785408   ;;  %v350_v23 = vlaneseq  ;;  %vm2947_vm2 = vmmov 0   ;;  %vm1097_vm0 = vcmask 7168  }
  0x42   : > { %2294 = vmatprep.subr.bf16.mxu0 %v2546_v1  ;;  %v2552_v4 = vld [vmem:[%s3095_s22] sm:$0xff]   ;;  %v2549_v5 = vld [vmem:[#allocation4 + $0x18] sm:$0xff]   ;;  %v2550_v6 = vld [vmem:[#allocation4 + $0x20] sm:$0xff]   ;;  %p2141_p10 = scmp.ne.s32.totalorder %s3019_s28, 1 }
  0x43   : > { %2295 = vmatpush3.bf16.msra.mxu0 %v2546_v1  ;;  %2306 = vmatprep.mubr.msk.bf16.mxu0 %vm430_vm1, %v2552_v4  ;;  %v2551_v7 = vld [vmem:[#allocation4 + $0x28] sm:$0xff]   ;;  %v2553_v8 = vld [vmem:[%s3095_s22 + $0x8] sm:$0xff]   ;;  %v2554_v9 = vld [vmem:[%s3095_s22 + $0x10] sm:$0xff]   ;;  %v3121_v24 = vshrl.u32 %v350_v23, 7 }
  0x44   : > { %2296 = vmatprep.subr.bf16.mxu0 %v2547_v2  ;;  %v2555_v10 = vld [vmem:[%s3095_s22 + $0x18] sm:$0xff]   ;;  %v2556_v11 = vld [vmem:[%s3095_s22 + $0x20] sm:$0xff]   ;;  %v2557_v12 = vld [vmem:[%s3095_s22 + $0x28] sm:$0xff]  }
  0x45   : > { %v2558_v13 = vld [vmem:[%s3095_s22 + $0x30] sm:$0xff]   ;;  %v2559_v14 = vld [vmem:[%s3095_s22 + $0x38] sm:$0xff]   ;;  %v2560_v15 = vld [vmem:[#allocation4 + $0x30] sm:$0xff]   ;;  %v3124_v25 = vsub.s32 0, %v3121_v24 }
  0x46   : > { %2322 = vmatprep.subr.bf16.mxu1 %v2560_v15  ;;  %v2561_v16 = vld [vmem:[#allocation4 + $0x38] sm:$0xff]   ;;  %v2562_v17 = vld [vmem:[#allocation4 + $0x40] sm:$0xff]   ;;  %v2563_v18 = vld [vmem:[#allocation4 + $0x48] sm:$0xff]  }
  0x47   : > { %2297 = vmatpush3.bf16.msra.mxu0 %v2547_v2  ;;  %2323 = vmatpush3.bf16.msra.mxu1 %v2560_v15  ;;  %v2564_v19 = vld [vmem:[#allocation4 + $0x50] sm:$0xff]   ;;  %v2565_v20 = vld [vmem:[#allocation4 + $0x58] sm:$0xff]   ;;  %v2566_v21 = vld [vmem:[#allocation4 + $0x60] sm:$0xff]  }
  0x48   : > { %2298 = vmatprep.subr.bf16.mxu0 %v2548_v3  ;;  %2324 = vmatprep.subr.bf16.mxu1 %v2561_v16  ;;  %v2567_v22 = vld [vmem:[#allocation4 + $0x68] sm:$0xff]   ;;  %v3129_v26 = vld [vmem:[%s3519_s4] sm:$0x3f] }
  0x49   : > { %v3133_v27 = vrot.slane %v3129_v26, %v3124_v25 }
  0x4b   : > { %2299 = vmatpush3.bf16.msra.mxu0 %v2548_v3  ;;  %2325 = vmatpush3.bf16.msra.mxu1 %v2561_v16 }
  0x4c   : > { %2300 = vmatprep.subr.bf16.mxu0 %v2549_v5  ;;  %2326 = vmatprep.subr.bf16.mxu1 %v2562_v17 }
  0x4f   : > { %2301 = vmatpush3.bf16.msra.mxu0 %v2549_v5  ;;  %2327 = vmatpush3.bf16.msra.mxu1 %v2562_v17 }
  0x50   : > { %2302 = vmatprep.subr.bf16.mxu0 %v2550_v6  ;;  %2328 = vmatprep.subr.bf16.mxu1 %v2563_v18 }
  0x53   : > { %2303 = vmatpush3.bf16.msra.mxu0 %v2550_v6  ;;  %2329 = vmatpush3.bf16.msra.mxu1 %v2563_v18 }
  0x54   : > { %2304 = vmatprep.subr.bf16.mxu0 %v2551_v7  ;;  %2330 = vmatprep.subr.bf16.mxu1 %v2564_v19 }
  0x57   : > { %2305 = vmatpush3.bf16.msra.mxu0 %v2551_v7  ;;  %2331 = vmatpush3.bf16.msra.mxu1 %v2564_v19 }
  0x58   : > { %2332 = vmatprep.subr.bf16.mxu1 %v2565_v20 }
  0x5a   : > { %2307 = vmatmul.mubr.msk.bf16.vlgmr.msra.gmra.mrb[0].mxu0 %vm430_vm1, %v2553_v8 }
  0x5b   : > { %2310 = vmatprep.mubr.msk.bf16.mxu0 %vm430_vm1, %v2554_v9  ;;  %2333 = vmatpush3.bf16.msra.mxu1 %v2565_v20 }
  0x5c   : > { %2334 = vmatprep.subr.bf16.mxu1 %v2566_v21 }
  0x5f   : > { %2335 = vmatpush3.bf16.msra.mxu1 %v2566_v21 }
  0x60   : > { %2336 = vmatprep.subr.bf16.mxu1 %v2567_v22 }
  0x62   : > { %2311 = vmatmul.mubr.msk.bf16.gmra.mrb[4].mxu0 %vm430_vm1, %v2555_v10 }
  0x63   : > { %2314 = vmatprep.mubr.msk.bf16.mxu0 %vm430_vm1, %v2556_v11  ;;  %2337 = vmatpush3.bf16.msra.mxu1 %v2567_v22 }
  0x6a   : > { %2315 = vmatmul.mubr.msk.bf16.gmra.mrb[8].mxu0 %vm430_vm1, %v2557_v12 }
  0x6b   : > { %2318 = vmatprep.mubr.msk.bf16.mxu0 %vm430_vm1, %v2558_v13 }
  0x72   : > { %2319 = vmatmul.mubr.msk.bf16.gmra.mrb[12].mxu0 %vm430_vm1, %v2559_v14  ;;  %vm1379_vm1 = vcmask (!%p2141_p10), 261120  }
 0x12d   : > { %v2308_v28 = vpop.f32.mrb[0].mxu0 }
 0x12e   : > { %v3136_v29 = vadd.f32 %v2308_v28, %v3133_v27  ;;  %v489_v30 = vpop.f32.mrb[1].mxu0 }
 0x12f   : > { %v3139_v31 = vadd.f32 %v489_v30, %v3133_v27  ;;  %v2309_v32 = vpop.f32.mrb[2].mxu0 }
 0x130   : > { %v570_v33 = vand.u32 2147483647, %v3136_v29  ;;  %v3143_v34 = vadd.f32 %v2309_v32, %v3133_v27  ;;  %v492_v35 = vpop.f32.mrb[3].mxu0 }
 0x131   : > { %v568_v36 = vand.u32 2147483647, %v3139_v31  ;;  %v3148_v42 = vadd.f32 %v492_v35, %v3133_v27 }
 0x132   : > { %v586_v37 = vsub.f32 0.0, %v570_v33  ;;  %v571_v38 = vand.u32 2147483647, %v3143_v34 }
 0x133   : > { %v584_v39 = vsub.f32 0.0, %v568_v36  ;;  %v569_v50 = vand.u32 2147483647, %v3148_v42 }
 0x134   : > { %v604_v40 = vmul.f32 1.442695, %v586_v37  ;;  %v587_v41 = vsub.f32 0.0, %v571_v38 }
 0x135   : > { %v600_v43 = vmul.f32 1.442695, %v584_v39  ;;  %v2312_v44 = vpop.f32.mrb[4].mxu0  ;;  %v585_v60 = vsub.f32 0.0, %v569_v50 }
 0x136   : > { %2568 = vpow2.f32 %v604_v40  ;;  %v606_v45 = vmul.f32 1.442695, %v587_v41  ;;  %v3151_v46 = vadd.f32 %v2312_v44, %v3133_v27  ;;  %v505_v47 = vpop.f32.mrb[5].mxu0 }
 0x137   : > { %2570 = vpow2.f32 %v600_v43  ;;  %v3154_v48 = vadd.f32 %v505_v47, %v3133_v27  ;;  %v2313_v49 = vpop.f32.mrb[6].mxu0  ;;  %v602_v9 = vmul.f32 1.442695, %v585_v60 }
 0x138   : > { %2572 = vpow2.f32 %v606_v45  ;;  %v574_v51 = vand.u32 2147483647, %v3151_v46  ;;  %v3159_v52 = vadd.f32 %v2313_v49, %v3133_v27  ;;  %v508_v53 = vpop.f32.mrb[7].mxu0 }
 0x139   : > { %v572_v54 = vand.u32 2147483647, %v3154_v48  ;;  %v3163_v55 = vadd.f32 %v508_v53, %v3133_v27 }
 0x13a   : > { %v590_v56 = vsub.f32 0.0, %v574_v51  ;;  %v575_v57 = vand.u32 2147483647, %v3159_v52 }
 0x13b   : > { %v588_v58 = vsub.f32 0.0, %v572_v54  ;;  %v573_v59 = vand.u32 2147483647, %v3163_v55 }
 0x13c   : > { %v612_v61 = vmul.f32 1.442695, %v590_v56  ;;  %v591_v62 = vsub.f32 0.0, %v575_v57 }
 0x13d   : > { %v608_v63 = vmul.f32 1.442695, %v588_v58  ;;  %v589_v0 = vsub.f32 0.0, %v573_v59  ;;  %v2316_v1 = vpop.f32.mrb[8].mxu0 }
 0x13e   : > { %2574 = vpow2.f32 %v612_v61  ;;  %v614_v2 = vmul.f32 1.442695, %v591_v62  ;;  %v3168_v3 = vadd.f32 %v2316_v1, %v3133_v27  ;;  %v521_v4 = vpop.f32.mrb[9].mxu0 }
 0x13f   : > { %2576 = vpow2.f32 %v608_v63  ;;  %v610_v5 = vmul.f32 1.442695, %v589_v0  ;;  %v3171_v6 = vadd.f32 %v521_v4, %v3133_v27  ;;  %v2317_v7 = vpop.f32.mrb[10].mxu0 }
 0x140   : > { %v2569_v8 = vpop.eup %2568  ;;  %2578 = vpow2.f32 %v614_v2  ;;  %v578_v10 = vand.u32 2147483647, %v3168_v3  ;;  %v3175_v11 = vadd.f32 %v2317_v7, %v3133_v27  ;;  %v524_v12 = vpop.f32.mrb[11].mxu0 }
 0x141   : > { %v2571_v13 = vpop.eup %2570  ;;  %v634_v14 = vadd.f32 1.0, %v2569_v8  ;;  %2580 = vpow2.f32 %v610_v5  ;;  %v576_v15 = vand.u32 2147483647, %v3171_v6  ;;  %v3180_v21 = vadd.f32 %v524_v12, %v3133_v27 }
 0x142   : > { %v2573_v16 = vpop.eup %2572  ;;  %v594_v17 = vsub.f32 0.0, %v578_v10  ;;  %v579_v18 = vand.u32 2147483647, %v3175_v11  ;;  %v632_v28 = vadd.f32 1.0, %v2571_v13  ;;  %v555_v13 = vmax.f32 %v3143_v34, 0.0 }
 0x143   : > { %2582 = vlog2.f32 %v634_v14  ;;  %v635_v19 = vadd.f32 1.0, %v2573_v16  ;;  %v592_v20 = vsub.f32 0.0, %v576_v15  ;;  %v577_v32 = vand.u32 2147483647, %v3180_v21 }
 0x144   : > { %2584 = vpow2.f32 %v602_v9  ;;  %v620_v22 = vmul.f32 1.442695, %v594_v17  ;;  %v595_v23 = vsub.f32 0.0, %v579_v18 }
 0x145   : > { %2586 = vlog2.f32 %v635_v19  ;;  %v616_v30 = vmul.f32 1.442695, %v592_v20  ;;  %v2320_v33 = vpop.f32.mrb[12].mxu0  ;;  %v593_v38 = vsub.f32 0.0, %v577_v32 }
 0x146   : > { %2588 = vpow2.f32 %v620_v22  ;;  %v622_v35 = vmul.f32 1.442695, %v595_v23  ;;  %v3184_v36 = vadd.f32 %v2320_v33, %v3133_v27  ;;  %v537_v37 = vpop.f32.mrb[13].mxu0 }
 0x147   : > { %2590 = vpow2.f32 %v616_v30  ;;  %v3187_v39 = vadd.f32 %v537_v37, %v3133_v27  ;;  %v2321_v40 = vpop.f32.mrb[14].mxu0  ;;  %v618_v54 = vmul.f32 1.442695, %v593_v38 }
 0x148   : > { %v2575_v41 = vpop.eup %2574  ;;  %2592 = vpow2.f32 %v622_v35  ;;  %v582_v43 = vand.u32 2147483647, %v3184_v36  ;;  %v3191_v44 = vadd.f32 %v2321_v40, %v3133_v27  ;;  %v540_v45 = vpop.f32.mrb[15].mxu0  ;;  %v558_v40 = vmax.f32 %v3151_v46, 0.0 }
 0x149   : > { %v2577_v47 = vpop.eup %2576  ;;  %v638_v49 = vadd.f32 1.0, %v2575_v41  ;;  %v580_v50 = vand.u32 2147483647, %v3187_v39  ;;  %2594 = vlog2.f32 %v632_v28  ;;  %v3196_v61 = vadd.f32 %v540_v45, %v3133_v27 }
 0x14a   : > { %v2579_v51 = vpop.eup %2578  ;;  %v636_v53 = vadd.f32 1.0, %v2577_v47  ;;  %v598_v56 = vsub.f32 0.0, %v582_v43  ;;  %v583_v57 = vand.u32 2147483647, %v3191_v44  ;;  %v554_v27 = vmax.f32 %v3136_v29, 0.0 }
 0x14b   : > { %v2581_v58 = vpop.eup %2580  ;;  %2596 = vlog2.f32 %v638_v49  ;;  %v639_v59 = vadd.f32 1.0, %v2579_v51  ;;  %v596_v60 = vsub.f32 0.0, %v580_v50  ;;  %v581_v4 = vand.u32 2147483647, %v3196_v61 }
 0x14c   : > { %2598 = vlog2.f32 %v636_v53  ;;  %v637_v62 = vadd.f32 1.0, %v2581_v58  ;;  %v628_v63 = vmul.f32 1.442695, %v598_v56  ;;  %v599_v0 = vsub.f32 0.0, %v583_v57 }
 0x14d   : > { %v2583_v1 = vpop.eup %2582  ;;  %2600 = vlog2.f32 %v639_v59  ;;  %v624_v2 = vmul.f32 1.442695, %v596_v60  ;;  %v597_v10 = vsub.f32 0.0, %v581_v4  ;;  %v559_v41 = vmax.f32 %v3159_v52, 0.0 }
 0x14e   : > { %v2585_v5 = vpop.eup %2584  ;;  %v653_v7 = vmul.f32 0.6931472, %v2583_v1  ;;  %2602 = vlog2.f32 %v637_v62  ;;  %v630_v8 = vmul.f32 1.442695, %v599_v0  ;;  %v556_v47 = vmax.f32 %v3154_v48, 0.0 }
 0x14f   : > { %v2587_v9 = vpop.eup %2586  ;;  %2604 = vpow2.f32 %v618_v54  ;;  %v626_v20 = vmul.f32 1.442695, %v597_v10  ;;  %v633_v23 = vadd.f32 1.0, %v2585_v5  ;;  %v557_v49 = vmax.f32 %v3163_v55, 0.0 }
 0x150   : > { %v2589_v12 = vpop.eup %2588  ;;  %v655_v14 = vmul.f32 0.6931472, %v2587_v9  ;;  %2606 = vpow2.f32 %v628_v63  ;;  %v3201_v18 = vadd.f32 %v653_v7, %v554_v27  ;;  %v562_v4 = vmax.f32 %v3168_v3, 0.0 }
 0x151   : > { %v2591_v15 = vpop.eup %2590  ;;  %v642_v16 = vadd.f32 1.0, %v2589_v12  ;;  %2608 = vpow2.f32 %v624_v2  ;;  %v563_v5 = vmax.f32 %v3175_v11, 0.0  ;;  %v552_v10 = vmax.f32 %v3139_v31, 0.0 }
 0x152   : > { %v2593_v17 = vpop.eup %2592  ;;  %v3203_v19 = vadd.f32 %v655_v14, %v555_v13  ;;  %2610 = vpow2.f32 %v630_v8  ;;  %v640_v30 = vadd.f32 1.0, %v2591_v15  ;;  %v553_v13 = vmax.f32 %v3148_v42, 0.0 }
 0x153   : > { %v2595_v22 = vpop.eup %2594  ;;  %2612 = vlog2.f32 %v642_v16  ;;  %v643_v28 = vadd.f32 1.0, %v2593_v17 }
 0x154   : > { %v697_v29 = vpack.c.bf16 %v3203_v19, %v3201_v18  ;;  %v649_v8 = vmul.f32 0.6931472, %v2595_v22  ;;  %v560_v22 = vmax.f32 %v3171_v6, 0.0 }
 0x155   : > { %v2597_v34 = vpop.eup %2596  ;;  %2614 = vlog2.f32 %v643_v28 }
 0x156   : > { %v2599_v32 = vpop.eup %2598  ;;  %v661_v33 = vmul.f32 0.6931472, %v2597_v34  ;;  %2616 = vpow2.f32 %v626_v20  ;;  %v680_v17 = vadd.f32 %v649_v8, %v552_v10  ;;  %v561_v34 = vmax.f32 %v3180_v21, 0.0 }
 0x157   : > { %v2601_v35 = vpop.eup %2600  ;;  %v657_v37 = vmul.f32 0.6931472, %v2599_v32  ;;  %2618 = vlog2.f32 %v633_v23 }
 0x158   : > { %v2603_v38 = vpop.eup %2602  ;;  %v663_v43 = vmul.f32 0.6931472, %v2601_v35  ;;  %2620 = vlog2.f32 %v640_v30  ;;  %v3211_v53 = vadd.f32 %v661_v33, %v558_v40  ;;  %v567_v40 = vmax.f32 %v3191_v44, 0.0 }
 0x159   : > { %v2605_v45 = vpop.eup %2604  ;;  %v659_v50 = vmul.f32 0.6931472, %v2603_v38  ;;  %v684_v58 = vadd.f32 %v657_v37, %v556_v47  ;;  %v566_v38 = vmax.f32 %v3184_v36, 0.0  ;;  %v2946_v44 = vmov 0.0  }
 0x15a   : > { %v2607_v51 = vpop.eup %2606  ;;  %v3213_v54 = vadd.f32 %v663_v43, %v559_v41  ;;  %v641_v56 = vadd.f32 1.0, %v2605_v45  ;;  %2354 = vmatprep.subr.bf16.mxu0 %v2946_v44  ;;  %2450 = vmatprep.subr.bf16.mxu1 %v2946_v44 }
 0x15b   : > { %v2609_v57 = vpop.eup %2608  ;;  %v685_v59 = vadd.f32 %v659_v50, %v557_v49  ;;  %v646_v46 = vadd.f32 1.0, %v2607_v51  ;;  %v564_v49 = vmax.f32 %v3187_v39, 0.0  ;;  %v565_v50 = vmax.f32 %v3196_v61, 0.0  ;;  %v1029_v39 = vld [vmem:[%s303_s8] sm:$0x1]  ;;  %2370 = vmatprep.mubr.msk.bf16.mxu0 %vm2947_vm2, %v2946_v44 }
 0x15c   : > { %v2611_v60 = vpop.eup %2610  ;;  %2622 = vlog2.f32 %v641_v56  ;;  %v644_v52 = vadd.f32 1.0, %v2609_v57  ;;  %v699_v62 = vpack.c.bf16 %v3213_v54, %v3211_v53  ;;  %v1032_v61 = vadd.s32 8, %v3121_v24 }
 0x15d   : > { %v2613_v48 = vpop.eup %2612  ;;  %2624 = vlog2.f32 %v646_v46  ;;  %v647_v55 = vadd.f32 1.0, %v2611_v60  ;;  %v698_v63 = vpack.c.bf16 %v685_v59, %v684_v58  ;;  %vm1050_vm6 = vcmp.ge.s32.totalorder %v1029_v39, 0 }
 0x15e   : > { %v669_v0 = vmul.f32 0.6931472, %v2613_v48  ;;  %2626 = vlog2.f32 %v644_v52  ;;  %v2948_v56 = vmov 0   ;;  %v1033_v58 = vadd.s32 16, %v3121_v24 }
 0x15f   : > { %v2615_v1 = vpop.eup %2614  ;;  %2628 = vlog2.f32 %v647_v55  ;;  %v1051_v57 = vsel %vm1050_vm6, 1, %v2948_v56  ;;  %v1034_v59 = vadd.s32 24, %v3121_v24  ;;  %v1035_v46 = vadd.s32 32, %v3121_v24 }
 0x160   : > { %v2617_v2 = vpop.eup %2616  ;;  %v671_v7 = vmul.f32 0.6931472, %v2615_v1  ;;  %v690_v14 = vadd.f32 %v669_v0, %v562_v4  ;;  %v1055_v60 = vrot.slane %v1051_v57, %v3124_v25  ;;  %v722_v1 = vsub.s32 1, %v3121_v24 }
 0x161   : > { %v2619_v9 = vpop.eup %2618  ;;  %v645_v12 = vadd.f32 1.0, %v2617_v2  ;;  %vm1049_vm10 = vcmp.eq.s32.totalorder %v1035_v46, 32 }
 0x162   : > { %v2621_v27 = vpop.eup %2620  ;;  %v691_v15 = vadd.f32 %v671_v7, %v563_v5  ;;  %v651_v16 = vmul.f32 0.6931472, %v2619_v9  ;;  %vm1056_vm11 = vcmp.eq.s32.totalorder %v1055_v60, 1  ;;  %v3275_v2 = vrot.slane %v3129_v26, %v722_v1 }
 0x163   : > { %2630 = vlog2.f32 %v645_v12  ;;  %v665_v28 = vmul.f32 0.6931472, %v2621_v27  ;;  %vm1061_vm13 = vmand %vm1049_vm10, %vm1056_vm11 }
 0x164   : > { %v681_v20 = vadd.f32 %v651_v16, %v553_v13  ;;  %v701_v23 = vpack.c.bf16 %v691_v15, %v690_v14 }
 0x165   : > { %v688_v35 = vadd.f32 %v665_v28, %v560_v22 }
 0x166   : > { %v2623_v3 = vpop.eup %2622  ;;  %v696_v30 = vpack.c.bf16 %v681_v20, %v680_v17 }
 0x167   : > { %v2625_v11 = vpop.eup %2624  ;;  %v667_v31 = vmul.f32 0.6931472, %v2623_v3 }
 0x168   : > { %v2627_v32 = vpop.eup %2626  ;;  %v677_v33 = vmul.f32 0.6931472, %v2625_v11  ;;  %2338 = vmatprep.mubr.bf16.mxu1 %v696_v30 }
 0x169   : > { %v2629_v42 = vpop.eup %2628  ;;  %v689_v37 = vadd.f32 %v667_v31, %v561_v34  ;;  %2339 = vmatmul.mubr.bf16.vlgmr.msra.gmra.mrb[0].mxu1 %v697_v29  ;;  %v673_v21 = vmul.f32 0.6931472, %v2627_v32  ;;  %v1039_v29 = vrot.slane %v1029_v39, %v3124_v25 }
 0x16a   : > { %v679_v41 = vmul.f32 0.6931472, %v2629_v42  ;;  %2342 = vmatprep.mubr.bf16.mxu1 %v698_v63  ;;  %v694_v43 = vadd.f32 %v677_v33, %v566_v38  ;;  %v1079_v63 = vld [vmem:[#allocation3 + $0x10] sm:$0xff] }
 0x16b   : > { %v700_v6 = vpack.c.bf16 %v689_v37, %v688_v35  ;;  %v692_v18 = vadd.f32 %v673_v21, %v564_v49  ;;  %vm1040_vm3 = vcmp.eq.s32.totalorder %v3121_v24, %v1039_v29  ;;  %vm1041_vm4 = vcmp.eq.s32.totalorder %v1032_v61, %v1039_v29 }
 0x16c   : > { %v695_v45 = vadd.f32 %v679_v41, %v567_v40  ;;  %vm3247_vm5 = vmpackc.low %vm1041_vm4, %vm1040_vm3  ;;  %vm1042_vm7 = vcmp.eq.s32.totalorder %v1033_v58, %v1039_v29  ;;  %vm1043_vm8 = vcmp.eq.s32.totalorder %v1034_v59, %v1039_v29  ;;  %vm1044_vm12 = vcmp.eq.s32.totalorder %v1035_v46, %v1039_v29 }
 0x16d   : > { %v2631_v47 = vpop.eup %2630  ;;  %vm3255_vm9 = vmpackc.low %vm1043_vm8, %vm1042_vm7  ;;  %v2132_v48 = vsel %vm1042_vm7, 1.0, %v2946_v44  ;;  %v2131_v55 = vsel %vm1041_vm4, 1.0, %v2946_v44  ;;  %v2133_v25 = vsel %vm1043_vm8, 1.0, %v2946_v44 }
 0x16e   : > { %v675_v51 = vmul.f32 0.6931472, %v2631_v47  ;;  %v703_v53 = vpack.c.bf16 %v695_v45, %v694_v43  ;;  %1086 = vadd.xlane.f32.xlu1 %v2132_v48  ;;  %vm3266_vm14 = vmor %vm1044_vm12, %vm1061_vm13 }
 0x16f   : > { %v2134_v0 = vsel %vm3266_vm14, 1.0, %v2946_v44  ;;  %vm2139_vm15 = vmpackc.low %vm3266_vm14, %vm3266_vm14 }
 0x170   : > { %v693_v19 = vadd.f32 %v675_v51, %v565_v50 }
 0x171   : > { %2343 = vmatmul.mubr.bf16.gmra.mrb[4].mxu1 %v699_v62  ;;  %v2130_v62 = vsel %vm1040_vm3, 1.0, %v2946_v44 }
 0x172   : > { %2346 = vmatprep.mubr.bf16.mxu1 %v700_v6  ;;  %v702_v36 = vpack.c.bf16 %v693_v19, %v692_v18  ;;  %1082 = vadd.xlane.f32.xlu0 %v2130_v62 }
 0x173   : > { %1088 = vadd.xlane.f32.xlu1 %v2133_v25 }
 0x176   : > { %1084 = vadd.xlane.f32.xlu0 %v2131_v55 }
 0x179   : > { %2347 = vmatmul.mubr.bf16.gmra.mrb[8].mxu1 %v701_v23 }
 0x17a   : > { %2350 = vmatprep.mubr.bf16.mxu1 %v702_v36  ;;  %1090 = vadd.xlane.f32.xlu0 %v2134_v0 }
 0x181   : > { %2351 = vmatmul.mubr.bf16.gmra.mrb[12].mxu1 %v703_v53 }
 0x182   : > { %2378 = vmatprep.mubr.msk.bf16.mxu1 %vm2947_vm2, %v2946_v44 }
 0x23c   : > { %v2340_v4 = vpop.f32.mrb[0].mxu1 }
 0x23d   : > { %v3278_v5 = vadd.f32 %v2340_v4, %v3275_v2  ;;  %v806_v7 = vpop.f32.mrb[1].mxu1 }
 0x23e   : > { %v3281_v8 = vadd.f32 %v806_v7, %v3275_v2  ;;  %v2341_v9 = vpop.f32.mrb[2].mxu1 }
 0x23f   : > { %v887_v10 = vand.u32 2147483647, %v3278_v5  ;;  %v3285_v12 = vadd.f32 %v2341_v9, %v3275_v2  ;;  %v809_v27 = vpop.f32.mrb[3].mxu1 }
 0x240   : > { %v885_v13 = vand.u32 2147483647, %v3281_v8  ;;  %v3289_v14 = vadd.f32 %v809_v27, %v3275_v2 }
 0x241   : > { %v903_v15 = vsub.f32 0.0, %v887_v10  ;;  %v888_v16 = vand.u32 2147483647, %v3285_v12 }
 0x242   : > { %v901_v17 = vsub.f32 0.0, %v885_v13  ;;  %v886_v20 = vand.u32 2147483647, %v3289_v14 }
 0x243   : > { %v921_v23 = vmul.f32 1.442695, %v903_v15  ;;  %v904_v28 = vsub.f32 0.0, %v888_v16 }
 0x244   : > { %v917_v3 = vmul.f32 1.442695, %v901_v17  ;;  %v902_v30 = vsub.f32 0.0, %v886_v20  ;;  %v2344_v11 = vpop.f32.mrb[4].mxu1 }
 0x245   : > { %2632 = vpow2.f32 %v921_v23  ;;  %v923_v22 = vmul.f32 1.442695, %v904_v28  ;;  %v3294_v34 = vadd.f32 %v2344_v11, %v3275_v2  ;;  %v822_v31 = vpop.f32.mrb[5].mxu1 }
 0x246   : > { %2634 = vpow2.f32 %v917_v3  ;;  %v919_v32 = vmul.f32 1.442695, %v902_v30  ;;  %v3297_v33 = vadd.f32 %v822_v31, %v3275_v2  ;;  %v2345_v42 = vpop.f32.mrb[6].mxu1 }
 0x247   : > { %2636 = vpow2.f32 %v923_v22  ;;  %v891_v35 = vand.u32 2147483647, %v3294_v34  ;;  %v3301_v37 = vadd.f32 %v2345_v42, %v3275_v2  ;;  %v825_v38 = vpop.f32.mrb[7].mxu1 }
 0x248   : > { %2638 = vpow2.f32 %v919_v32  ;;  %v889_v40 = vand.u32 2147483647, %v3297_v33  ;;  %v3305_v41 = vadd.f32 %v825_v38, %v3275_v2  ;;  %v871_v38 = vmax.f32 %v3278_v5, 0.0 }
 0x249   : > { %v907_v6 = vsub.f32 0.0, %v891_v35  ;;  %v892_v43 = vand.u32 2147483647, %v3301_v37 }
 0x24a   : > { %v905_v21 = vsub.f32 0.0, %v889_v40  ;;  %v890_v45 = vand.u32 2147483647, %v3305_v41 }
 0x24b   : > { %v929_v47 = vmul.f32 1.442695, %v907_v6  ;;  %v908_v49 = vsub.f32 0.0, %v892_v43 }
 0x24c   : > { %v925_v50 = vmul.f32 1.442695, %v905_v21  ;;  %v906_v51 = vsub.f32 0.0, %v890_v45  ;;  %v2348_v53 = vpop.f32.mrb[8].mxu1 }
 0x24d   : > { %2640 = vpow2.f32 %v929_v47  ;;  %v931_v18 = vmul.f32 1.442695, %v908_v49  ;;  %v3310_v19 = vadd.f32 %v2348_v53, %v3275_v2  ;;  %v838_v36 = vpop.f32.mrb[9].mxu1 }
 0x24e   : > { %2642 = vpow2.f32 %v925_v50  ;;  %v927_v39 = vmul.f32 1.442695, %v906_v51  ;;  %v3313_v61 = vadd.f32 %v838_v36, %v3275_v2  ;;  %v2349_v29 = vpop.f32.mrb[10].mxu1 }
 0x24f   : > { %v2633_v56 = vpop.eup %2632  ;;  %2644 = vpow2.f32 %v931_v18  ;;  %v895_v57 = vand.u32 2147483647, %v3310_v19  ;;  %v3317_v58 = vadd.f32 %v2349_v29, %v3275_v2  ;;  %v841_v59 = vpop.f32.mrb[11].mxu1  ;;  %v869_v29 = vmax.f32 %v3281_v8, 0.0 }
 0x250   : > { %v2635_v46 = vpop.eup %2634  ;;  %v951_v60 = vadd.f32 1.0, %v2633_v56  ;;  %2646 = vpow2.f32 %v927_v39  ;;  %v893_v62 = vand.u32 2147483647, %v3313_v61  ;;  %v3322_v9 = vadd.f32 %v841_v59, %v3275_v2 }
 0x251   : > { %v2637_v48 = vpop.eup %2636  ;;  %v949_v55 = vadd.f32 1.0, %v2635_v46  ;;  %v911_v25 = vsub.f32 0.0, %v895_v57  ;;  %v896_v0 = vand.u32 2147483647, %v3317_v58 }
 0x252   : > { %v2639_v1 = vpop.eup %2638  ;;  %2648 = vlog2.f32 %v951_v60  ;;  %v952_v4 = vadd.f32 1.0, %v2637_v48  ;;  %v909_v7 = vsub.f32 0.0, %v893_v62  ;;  %v894_v16 = vand.u32 2147483647, %v3322_v9 }
 0x253   : > { %2650 = vlog2.f32 %v949_v55  ;;  %v950_v10 = vadd.f32 1.0, %v2639_v1  ;;  %v937_v27 = vmul.f32 1.442695, %v911_v25  ;;  %v912_v13 = vsub.f32 0.0, %v896_v0 }
 0x254   : > { %2652 = vlog2.f32 %v952_v4  ;;  %v933_v15 = vmul.f32 1.442695, %v909_v7  ;;  %v2352_v17 = vpop.f32.mrb[12].mxu1  ;;  %v910_v3 = vsub.f32 0.0, %v894_v16  ;;  %v872_v60 = vmax.f32 %v3285_v12, 0.0 }
 0x255   : > { %2654 = vlog2.f32 %v950_v10  ;;  %v939_v20 = vmul.f32 1.442695, %v912_v13  ;;  %v3326_v23 = vadd.f32 %v2352_v17, %v3275_v2  ;;  %v854_v28 = vpop.f32.mrb[13].mxu1  ;;  %v870_v4 = vmax.f32 %v3289_v14, 0.0 }
 0x256   : > { %2656 = vpow2.f32 %v937_v27  ;;  %v3329_v30 = vadd.f32 %v854_v28, %v3275_v2  ;;  %v2353_v11 = vpop.f32.mrb[14].mxu1  ;;  %v935_v21 = vmul.f32 1.442695, %v910_v3 }
 0x257   : > { %v2641_v22 = vpop.eup %2640  ;;  %2658 = vpow2.f32 %v933_v15  ;;  %v899_v31 = vand.u32 2147483647, %v3326_v23  ;;  %v3333_v32 = vadd.f32 %v2353_v11, %v3275_v2  ;;  %v857_v42 = vpop.f32.mrb[15].mxu1 }
 0x258   : > { %v2643_v35 = vpop.eup %2642  ;;  %v955_v40 = vadd.f32 1.0, %v2641_v22  ;;  %2660 = vpow2.f32 %v939_v20  ;;  %v897_v47 = vand.u32 2147483647, %v3329_v30  ;;  %v3339_v53 = vadd.f32 %v857_v42, %v3275_v2 }
 0x259   : > { %v2645_v6 = vpop.eup %2644  ;;  %v953_v43 = vadd.f32 1.0, %v2643_v35  ;;  %v915_v45 = vsub.f32 0.0, %v899_v31  ;;  %v900_v51 = vand.u32 2147483647, %v3333_v32  ;;  %v875_v42 = vmax.f32 %v3294_v34, 0.0 }
 0x25a   : > { %v2647_v49 = vpop.eup %2646  ;;  %2662 = vlog2.f32 %v955_v40  ;;  %v956_v50 = vadd.f32 1.0, %v2645_v6  ;;  %v913_v5 = vsub.f32 0.0, %v897_v47  ;;  %v898_v57 = vand.u32 2147483647, %v3339_v53 }
 0x25b   : > { %2664 = vlog2.f32 %v953_v43  ;;  %v954_v18 = vadd.f32 1.0, %v2647_v49  ;;  %v945_v36 = vmul.f32 1.442695, %v915_v45  ;;  %v916_v56 = vsub.f32 0.0, %v900_v51 }
 0x25c   : > { %v2649_v39 = vpop.eup %2648  ;;  %2666 = vlog2.f32 %v956_v50  ;;  %v941_v62 = vmul.f32 1.442695, %v913_v5  ;;  %v914_v25 = vsub.f32 0.0, %v898_v57  ;;  %v873_v40 = vmax.f32 %v3297_v33, 0.0 }
 0x25d   : > { %v2651_v59 = vpop.eup %2650  ;;  %v970_v46 = vmul.f32 0.6931472, %v2649_v39  ;;  %2668 = vlog2.f32 %v954_v18  ;;  %v947_v55 = vmul.f32 1.442695, %v916_v56  ;;  %v876_v45 = vmax.f32 %v3301_v37, 0.0 }
 0x25e   : > { %v2653_v48 = vpop.eup %2652  ;;  %v966_v2 = vmul.f32 0.6931472, %v2651_v59  ;;  %2670 = vpow2.f32 %v935_v21  ;;  %v943_v12 = vmul.f32 1.442695, %v914_v25  ;;  %v874_v50 = vmax.f32 %v3305_v41, 0.0 }
 0x25f   : > { %v2655_v0 = vpop.eup %2654  ;;  %v999_v1 = vadd.f32 %v970_v46, %v871_v38  ;;  %v972_v8 = vmul.f32 0.6931472, %v2653_v48  ;;  %2672 = vpow2.f32 %v945_v36 }
 0x260   : > { %v2657_v7 = vpop.eup %2656  ;;  %v997_v10 = vadd.f32 %v966_v2, %v869_v29  ;;  %v968_v27 = vmul.f32 0.6931472, %v2655_v0  ;;  %2674 = vpow2.f32 %v941_v62  ;;  %v879_v2 = vmax.f32 %v3310_v19, 0.0 }
 0x261   : > { %v2659_v13 = vpop.eup %2658  ;;  %1015 = vst [vmem:[%s3101_s9 + $0x10] sm:$0xff] %v999_v1  ;;  %v1000_v15 = vadd.f32 %v972_v8, %v872_v60  ;;  %v959_v16 = vadd.f32 1.0, %v2657_v7  ;;  %2676 = vpow2.f32 %v947_v55  ;;  %v877_v0 = vmax.f32 %v3313_v61, 0.0 }
 0x262   : > { %v2661_v17 = vpop.eup %2660  ;;  %1013 = vst [vmem:[%s3101_s9] sm:$0xff] %v997_v10  ;;  %v998_v20 = vadd.f32 %v968_v27, %v870_v4  ;;  %v957_v28 = vadd.f32 1.0, %v2659_v13  ;;  %2678 = vpow2.f32 %v943_v12  ;;  %v880_v4 = vmax.f32 %v3317_v58, 0.0 }
 0x263   : > { %1016 = vst [vmem:[%s3101_s9 + $0x18] sm:$0xff] %v1000_v15  ;;  %v1112_v14 = vpack.c.bf16 %v1000_v15, %v999_v1  ;;  %2680 = vlog2.f32 %v959_v16  ;;  %v960_v3 = vadd.f32 1.0, %v2661_v17  ;;  %v878_v13 = vmax.f32 %v3322_v9, 0.0 }
 0x264   : > { %v2663_v11 = vpop.eup %2662  ;;  %1014 = vst [vmem:[%s3101_s9 + $0x8] sm:$0xff] %v998_v20  ;;  %v1111_v22 = vpack.c.bf16 %v998_v20, %v997_v10  ;;  %2682 = vlog2.f32 %v957_v28  ;;  %v883_v16 = vmax.f32 %v3326_v23, 0.0 }
 0x265   : > { %v2665_v31 = vpop.eup %2664  ;;  %v978_v35 = vmul.f32 0.6931472, %v2663_v11  ;;  %2684 = vlog2.f32 %v960_v3 }
 0x266   : > { %v2667_v38 = vpop.eup %2666  ;;  %v974_v6 = vmul.f32 0.6931472, %v2665_v31  ;;  %2355 = vmatpush3.bf16.msra.mxu0 %v1111_v22  ;;  %2458 = vmatpush3.bf16.msra.mxu1 %v1111_v22  ;;  %v884_v31 = vmax.f32 %v3333_v32, 0.0 }
 0x267   : > { %v2669_v43 = vpop.eup %2668  ;;  %v1003_v21 = vadd.f32 %v978_v35, %v875_v42  ;;  %v980_v47 = vmul.f32 0.6931472, %v2667_v38  ;;  %2356 = vmatprep.subr.bf16.mxu0 %v2946_v44  ;;  %2451 = vmatprep.subr.bf16.mxu1 %v2946_v44  ;;  %v882_v38 = vmax.f32 %v3339_v53, 0.0  ;;  %v2949_v53 = vmov 1.0|1.0  }
 0x268   : > { %v2671_v34 = vpop.eup %2670  ;;  %v1001_v49 = vadd.f32 %v974_v6, %v873_v40  ;;  %v976_v51 = vmul.f32 0.6931472, %v2669_v43  ;;  %v1077_v43 = vld [vmem:[#allocation3] sm:$0xff] }
 0x269   : > { %v2673_v33 = vpop.eup %2672  ;;  %1019 = vst [vmem:[%s3101_s9 + $0x30] sm:$0xff] %v1003_v21  ;;  %v1004_v18 = vadd.f32 %v980_v47, %v876_v45  ;;  %v958_v36 = vadd.f32 1.0, %v2671_v34  ;;  %v1087_v47 = vpop.xlane.xlu1 %1086  ;;  %v1078_v34 = vld [vmem:[#allocation3 + $0x8] sm:$0xff] }
 0x26a   : > { %v2675_v5 = vpop.eup %2674  ;;  %1017 = vst [vmem:[%s3101_s9 + $0x20] sm:$0xff] %v1001_v49  ;;  %v1002_v39 = vadd.f32 %v976_v51, %v874_v50  ;;  %v963_v37 = vadd.f32 1.0, %v2673_v33  ;;  %2357 = vmatpush3.bf16.msra.mxu0 %v1112_v14  ;;  %2459 = vmatpush3.bf16.msra.mxu1 %v1112_v14  ;;  %v881_v14 = vmax.f32 %v3329_v30, 0.0 }
 0x26b   : > { %v2677_v29 = vpop.eup %2676  ;;  %1020 = vst [vmem:[%s3101_s9 + $0x38] sm:$0xff] %v1004_v18  ;;  %v1114_v56 = vpack.c.bf16 %v1004_v18, %v1003_v21  ;;  %2686 = vlog2.f32 %v958_v36  ;;  %v961_v57 = vadd.f32 1.0, %v2675_v5  ;;  %2358 = vmatprep.subr.bf16.mxu0 %v2946_v44  ;;  %2452 = vmatprep.subr.bf16.mxu1 %v2946_v44  ;;  %v1083_v21 = vpop.xlane.xlu0 %1082  ;;  %v1081_v18 = vld [vmem:[#allocation3 + $0x20] sm:$0xff]  ;;  %v1103_v5 = vld [vmem:[#allocation2] sm:$0xff] }
 0x26c   : > { %v2679_v41 = vpop.eup %2678  ;;  %1018 = vst [vmem:[%s3101_s9 + $0x28] sm:$0xff] %v1002_v39  ;;  %v1113_v59 = vpack.c.bf16 %v1002_v39, %v1001_v49  ;;  %2688 = vlog2.f32 %v963_v37  ;;  %v964_v46 = vadd.f32 1.0, %v2677_v29  ;;  %v1092_v45 = vadd.f32 %v1083_v21, %v1077_v43  ;;  %v1107_v39 = vld [vmem:[#allocation2 + $0x20] sm:$0xff]  ;;  %v1104_v29 = vld [vmem:[#allocation2 + $0x8] sm:$0xff] }
 0x26d   : > { %v2681_v60 = vpop.eup %2680  ;;  %2690 = vlog2.f32 %v961_v57  ;;  %v962_v62 = vadd.f32 1.0, %v2679_v41  ;;  %v1094_v49 = vadd.f32 %v1087_v47, %v1079_v63  ;;  %v1089_v51 = vpop.xlane.xlu1 %1088 }
 0x26e   : > { %v2683_v48 = vpop.eup %2682  ;;  %v986_v55 = vmul.f32 0.6931472, %v2681_v60  ;;  %2692 = vlog2.f32 %v964_v46  ;;  %2359 = vmatpush3.bf16.msra.mxu0 %v1113_v59  ;;  %2460 = vmatpush3.bf16.msra.mxu1 %v1113_v59  ;;  %1098 = vst.msk [vmem:[#allocation3] sm:$0xff] %vm1097_vm0, %v1092_v45 }
 0x26f   : > { %v2685_v25 = vpop.eup %2684  ;;  %v982_v1 = vmul.f32 0.6931472, %v2683_v48  ;;  %2694 = vlog2.f32 %v962_v62  ;;  %2360 = vmatprep.subr.bf16.mxu0 %v2946_v44  ;;  %2453 = vmatprep.subr.bf16.mxu1 %v2946_v44  ;;  %v1085_v50 = vpop.xlane.xlu0 %1084  ;;  %1100 = vst.msk [vmem:[#allocation3 + $0x10] sm:$0xff] %vm1097_vm0, %v1094_v49 }
 0x270   : > { %v1007_v8 = vadd.f32 %v986_v55, %v879_v2  ;;  %v988_v7 = vmul.f32 0.6931472, %v2685_v25  ;;  %v1093_v54 = vadd.f32 %v1085_v50, %v1078_v34  ;;  %v1105_v25 = vld [vmem:[#allocation2 + $0x10] sm:$0xff] }
 0x271   : > { %v1005_v19 = vadd.f32 %v982_v1, %v877_v0  ;;  %v1106_v1 = vld [vmem:[#allocation2 + $0x18] sm:$0xff] }
 0x272   : > { %1023 = vst [vmem:[%s3101_s9 + $0x50] sm:$0xff] %v1007_v8  ;;  %v1008_v10 = vadd.f32 %v988_v7, %v880_v4  ;;  %2361 = vmatpush3.bf16.msra.mxu0 %v1114_v56  ;;  %2461 = vmatpush3.bf16.msra.mxu1 %v1114_v56  ;;  %1099 = vst.msk [vmem:[#allocation3 + $0x8] sm:$0xff] %vm1097_vm0, %v1093_v54 }
 0x273   : > { %1021 = vst [vmem:[%s3101_s9 + $0x40] sm:$0xff] %v1005_v19  ;;  %2362 = vmatprep.subr.bf16.mxu0 %v2946_v44  ;;  %2454 = vmatprep.subr.bf16.mxu1 %v2946_v44  ;;  %v1091_v52 = vpop.xlane.xlu0 %1090 }
 0x274   : > { %1024 = vst [vmem:[%s3101_s9 + $0x58] sm:$0xff] %v1008_v10  ;;  %v1116_v61 = vpack.c.bf16 %v1008_v10, %v1007_v8  ;;  %v1096_v36 = vadd.f32 %v1091_v52, %v1081_v18  ;;  %v2708_v52 = vld [vmem:[%s3516_s1] sm:$0xff] (!%p2141_p10)   ;;  %v2709_v18 = vld [vmem:[%s3516_s1 + $0x8] sm:$0xff] (!%p2141_p10)  }
 0x275   : > { %v2687_v27 = vpop.eup %2686 }
 0x276   : > { %v2689_v12 = vpop.eup %2688  ;;  %v984_v15 = vmul.f32 0.6931472, %v2687_v27  ;;  %1102 = vst.msk [vmem:[#allocation3 + $0x20] sm:$0xff] %vm1097_vm0, %v1096_v36  ;;  %v1194_v27 = vld [vmem:[#allocation3] sm:$0xff] (!%p2141_p10)  ;;  %v2710_v36 = vld [vmem:[#allocation4 + $0xc0] sm:$0xff] (!%p2141_p10)  }
 0x277   : > { %v2691_v58 = vpop.eup %2690  ;;  %v994_v17 = vmul.f32 0.6931472, %v2689_v12 }
 0x278   : > { %v2693_v20 = vpop.eup %2692  ;;  %v1006_v28 = vadd.f32 %v984_v15, %v878_v13  ;;  %v990_v3 = vmul.f32 0.6931472, %v2691_v58  ;;  %v2950_v13 = vmov (!%p2141_p10), 0   ;;  %v1198_v58 = vmax.f32 (!%p2141_p10), %v1194_v27, 1.0 }
 0x279   : > { %v2695_v11 = vpop.eup %2694  ;;  %v1011_v22 = vadd.f32 %v994_v17, %v883_v16  ;;  %v996_v42 = vmul.f32 0.6931472, %v2693_v20  ;;  %2697 = vset.pattern.permute.xlu1 (!%p2141_p10), %v2950_v13  ;;  %2696 = vset.pattern.permute.xlu0 (!%p2141_p10), %v2950_v13  ;;  %v1195_v17 = vld [vmem:[#allocation3 + $0x8] sm:$0xff] (!%p2141_p10) }
 0x27a   : > { %1022 = vst [vmem:[%s3101_s9 + $0x48] sm:$0xff] %v1006_v28  ;;  %v1115_v9 = vpack.c.bf16 %v1006_v28, %v1005_v19  ;;  %v1009_v35 = vadd.f32 %v990_v3, %v881_v14  ;;  %v992_v23 = vmul.f32 0.6931472, %v2695_v11  ;;  %v1199_v20 = vmax.f32 (!%p2141_p10), %v1195_v17, 1.0  ;;  %v2698_v28 = vld [vmem:[#allocation4 + $0x80] sm:$0xff] (!%p2141_p10)   ;;  %v2699_v14 = vld [vmem:[#allocation4 + $0x88] sm:$0xff] (!%p2141_p10)  }
 0x27b   : > { %1027 = vst [vmem:[%s3101_s9 + $0x70] sm:$0xff] %v1011_v22  ;;  %v1012_v40 = vadd.f32 %v996_v42, %v884_v31  ;;  %v2700_v3 = vld [vmem:[#allocation4 + $0x90] sm:$0xff] (!%p2141_p10)   ;;  %v2701_v11 = vld [vmem:[#allocation4 + $0x98] sm:$0xff] (!%p2141_p10)   ;;  %v2702_v42 = vld [vmem:[#allocation4 + $0xa0] sm:$0xff] (!%p2141_p10)  }
 0x27c   : > { %1025 = vst [vmem:[%s3101_s9 + $0x60] sm:$0xff] %v1009_v35  ;;  %v1010_v6 = vadd.f32 %v992_v23, %v882_v38  ;;  %2363 = vmatpush3.bf16.msra.mxu0 %v1115_v9  ;;  %2462 = vmatpush3.bf16.msra.mxu1 %v1115_v9  ;;  %v2703_v38 = vld [vmem:[#allocation4 + $0xa8] sm:$0xff] (!%p2141_p10)   ;;  %v2704_v23 = vld [vmem:[#allocation4 + $0xb0] sm:$0xff] (!%p2141_p10)  }
 0x27d   : > { %1028 = vst [vmem:[%s3101_s9 + $0x78] sm:$0xff] %v1012_v40  ;;  %v1118_v30 = vpack.c.bf16 %v1012_v40, %v1011_v22  ;;  %2364 = vmatprep.subr.bf16.mxu0 %v2946_v44  ;;  %2455 = vmatprep.subr.bf16.mxu1 %v2946_v44  ;;  %v2705_v40 = vld [vmem:[#allocation4 + $0xb8] sm:$0xff] (!%p2141_p10)  }
 0x27e   : > { %1026 = vst [vmem:[%s3101_s9 + $0x68] sm:$0xff] %v1010_v6  ;;  %v1117_v32 = vpack.c.bf16 %v1010_v6, %v1009_v35  ;;  %v2706_v6 = vld [vmem:[#allocation4 + $0x70] sm:$0xff] (!%p2141_p10)  }
 0x280   : > { %2365 = vmatpush3.bf16.msra.mxu0 %v1116_v61  ;;  %2463 = vmatpush3.bf16.msra.mxu1 %v1116_v61  ;;  %v1196_v61 = vld [vmem:[#allocation3 + $0x10] sm:$0xff] (!%p2141_p10) }
 0x281   : > { %2366 = vmatprep.subr.bf16.mxu0 %v2946_v44  ;;  %2456 = vmatprep.subr.bf16.mxu1 %v2946_v44  ;;  %v1200_v15 = vmax.f32 (!%p2141_p10), %v1196_v61, 1.0 }
 0x283   : > { %2742 = vrcp.f32 (!%p2141_p10), %v1200_v15 }
 0x284   : > { %2367 = vmatpush3.bf16.msra.mxu0 %v1117_v32  ;;  %2464 = vmatpush3.bf16.msra.mxu1 %v1117_v32  ;;  %2744 = vrcp.f32 (!%p2141_p10), %v1198_v58 }
 0x285   : > { %2368 = vmatprep.subr.bf16.mxu0 %v2946_v44  ;;  %2457 = vmatprep.subr.bf16.mxu1 %v2946_v44 }
 0x288   : > { %2369 = vmatpush3.bf16.msra.mxu0 %v1118_v30  ;;  %2465 = vmatpush3.bf16.msra.mxu1 %v1118_v30 }
 0x289   : > { %2382 = vmatprep.subr.bf16.mxu0 (!%p2141_p10), %v2698_v28  ;;  %2410 = vmatprep.subr.bf16.mxu1 (!%p2141_p10), %v2710_v36 }
 0x28b   : > { %2371 = vmatmul.mubr.msk.bf16.vlgmr.msra.gmra.mrb[16].mxu0 %vm3247_vm5, %v2949_v53  ;;  %2379 = vmatmul.mubr.msk.bf16.vlgmr.msra.gmra.mrb[16].mxu1 %vm2139_vm15, %v2949_v53 }
 0x28c   : > { %2374 = vmatprep.mubr.msk.bf16.mxu0 %vm2947_vm2, %v2946_v44  ;;  %v1080_v44 = vld [vmem:[#allocation3 + $0x18] sm:$0xff]  ;;  %2383 = vmatpush3.bf16.msra.mxu0 (!%p2141_p10), %v2698_v28  ;;  %vm2952_vm2 = vmmov (!%p2141_p10), 0  }
 0x28d   : > { %v1095_v33 = vadd.f32 %v1089_v51, %v1080_v44  ;;  %2384 = vmatprep.subr.bf16.mxu0 (!%p2141_p10), %v2699_v14  ;;  %v2743_v22 = vpop.eup (!%p2141_p10), %2742  ;;  %2411 = vmatpush3.bf16.msra.mxu1 (!%p2141_p10), %v2710_v36  ;;  %v2724_v36 = vld [vmem:[#allocation4 + $0x158] sm:$0xff] (!%p2141_p10)  }
 0x28e   : > { %v2745_v31 = vpop.eup (!%p2141_p10), %2744  ;;  %1222 = vperm.xlu1 (!%p2141_p10), %2697, %v2743_v22  }
 0x28f   : > { %1101 = vst.msk [vmem:[#allocation3 + $0x18] sm:$0xff] %vm1097_vm0, %v1095_v33  ;;  %1212 = vperm.xlu0 (!%p2141_p10), %2696, %v2745_v31   ;;  %v2707_v33 = vld [vmem:[#allocation4 + $0x78] sm:$0xff] (!%p2141_p10)  }
 0x290   : > { %2385 = vmatpush3.bf16.msra.mxu0 (!%p2141_p10), %v2699_v14 }
 0x291   : > { %2386 = vmatprep.subr.bf16.mxu0 (!%p2141_p10), %v2700_v3 }
 0x293   : > { %2375 = vmatmul.mubr.msk.bf16.gmra.mrb[20].mxu0 %vm3255_vm9, %v2949_v53 }
 0x294   : > { %2387 = vmatpush3.bf16.msra.mxu0 (!%p2141_p10), %v2700_v3 }
 0x295   : > { %2388 = vmatprep.subr.bf16.mxu0 (!%p2141_p10), %v2701_v11 }
 0x296   : > { %v1197_v12 = vld [vmem:[#allocation3 + $0x18] sm:$0xff] (!%p2141_p10) }
 0x297   : > { %v1201_v16 = vmax.f32 (!%p2141_p10), %v1197_v12, 1.0 }
 0x298   : > { %2389 = vmatpush3.bf16.msra.mxu0 (!%p2141_p10), %v2701_v11 }
 0x299   : > { %2746 = vrcp.f32 (!%p2141_p10), %v1201_v16  ;;  %2390 = vmatprep.subr.bf16.mxu0 (!%p2141_p10), %v2702_v42 }
 0x29a   : > { %2748 = vrcp.f32 (!%p2141_p10), %v1199_v20 }
 0x29c   : > { %2391 = vmatpush3.bf16.msra.mxu0 (!%p2141_p10), %v2702_v42 }
 0x29d   : > { %2392 = vmatprep.subr.bf16.mxu0 (!%p2141_p10), %v2703_v38 }
 0x2a0   : > { %2393 = vmatpush3.bf16.msra.mxu0 (!%p2141_p10), %v2703_v38 }
 0x2a1   : > { %2394 = vmatprep.subr.bf16.mxu0 (!%p2141_p10), %v2704_v23 }
 0x2a3   : > { %v2747_v9 = vpop.eup (!%p2141_p10), %2746 }
 0x2a4   : > { %v2749_v35 = vpop.eup (!%p2141_p10), %2748  ;;  %1227 = vperm.xlu1 (!%p2141_p10), %2697, %v2747_v9   ;;  %2395 = vmatpush3.bf16.msra.mxu0 (!%p2141_p10), %v2704_v23 }
 0x2a5   : > { %1217 = vperm.xlu0 (!%p2141_p10), %2696, %v2749_v35   ;;  %2396 = vmatprep.subr.bf16.mxu0 (!%p2141_p10), %v2705_v40 }
 0x2a8   : > { %2397 = vmatpush3.bf16.msra.mxu0 (!%p2141_p10), %v2705_v40 }
 0x2a9   : > { %2402 = vmatprep.subr.bf16.mxu0 (!%p2141_p10), %v2706_v6 }
 0x30d   : > { %v1223_v30 = vpop.permute.xlu1 (!%p2141_p10), %1222 }
 0x30e   : > { %v1213_v32 = vpop.permute.xlu0 (!%p2141_p10), %1212 }
 0x323   : > { %v1228_v63 = vpop.permute.xlu1 (!%p2141_p10), %1227 }
 0x324   : > { %v1218_v49 = vpop.permute.xlu0 (!%p2141_p10), %1217 }
 0x35e   : > { %v1153_v37 = vpop.f32.mrb[16].mxu0  ;;  %v1169_v56 = vpop.f32.mrb[16].mxu1 }
 0x35f   : > { %v1175_v57 = vadd.f32 %v1153_v37, %v1103_v5  ;;  %v2372_v41 = vpop.f32.mrb[17].mxu0  ;;  %v1179_v59 = vadd.f32 %v1169_v56, %v1107_v39  ;;  %v2380_v46 = vpop.f32.mrb[17].mxu1  ;;  %v2711_v5 = vld [vmem:[#allocation4 + $0xc8] sm:$0xff] (!%p2141_p10)   ;;  %v2712_v39 = vld [vmem:[#allocation4 + $0xd0] sm:$0xff] (!%p2141_p10)   ;;  %v2713_v37 = vld [vmem:[#allocation4 + $0xd8] sm:$0xff] (!%p2141_p10)  }
 0x360   : > { %v1156_v60 = vpop.f32.mrb[18].mxu0  ;;  %v1172_v62 = vpop.f32.mrb[18].mxu1  ;;  %2412 = vmatprep.subr.bf16.mxu1 (!%p2141_p10), %v2711_v5  ;;  %v2715_v56 = vld [vmem:[#allocation4 + $0xe8] sm:$0xff] (!%p2141_p10)   ;;  %v2717_v41 = vld [vmem:[#allocation4 + $0xf8] sm:$0xff] (!%p2141_p10)  }
 0x361   : > { %1180 = vst [vmem:[#allocation2] sm:$0xff] %v1175_v57  ;;  %v1176_v48 = vadd.f32 %v1156_v60, %v1104_v29  ;;  %v2373_v2 = vpop.f32.mrb[19].mxu0  ;;  %1184 = vst [vmem:[#allocation2 + $0x20] sm:$0xff] %v1179_v59  ;;  %v2381_v55 = vpop.f32.mrb[19].mxu1  ;;  %2413 = vmatpush3.bf16.msra.mxu1 (!%p2141_p10), %v2711_v5  ;;  %v2714_v29 = vld [vmem:[#allocation4 + $0xe0] sm:$0xff] (!%p2141_p10)   ;;  %v2716_v57 = vld [vmem:[#allocation4 + $0xf0] sm:$0xff] (!%p2141_p10)  }
 0x362   : > { %2414 = vmatprep.subr.bf16.mxu1 (!%p2141_p10), %v2712_v39  ;;  %v1437_v59 = vsub.s32 (!%p2141_p10), 2, %v3121_v24  ;;  %v2725_v5 = vld [vmem:[#allocation4 + $0x118] sm:$0xff] (!%p2141_p10)  }
 0x363   : > { %1181 = vst [vmem:[#allocation2 + $0x8] sm:$0xff] %v1176_v48 }
 0x364   : > { %v1438_v46 = vrot.slane (!%p2141_p10), %v3129_v26, %v1437_v59  ;;  %v2732_v59 = vld [vmem:[#allocation4 + $0x178] sm:$0xff] (!%p2141_p10)  }
 0x365   : > { %1188 = sbr.rel (%p2141_p10) target bundleno = 1929 (0x789), region = 52  ;;  %2415 = vmatpush3.bf16.msra.mxu1 (!%p2141_p10), %v2712_v39  ;;  %v2726_v39 = vld [vmem:[#allocation4 + $0x160] sm:$0xff] (!%p2141_p10)  }
 0x366   : > { %v1161_v0 = vpop.f32.mrb[20].mxu0  ;;  %2416 = vmatprep.subr.bf16.mxu1 (!%p2141_p10), %v2713_v37 }
 0x367   : > { %v1177_v8 = vadd.f32 %v1161_v0, %v1105_v25  ;;  %v2376_v4 = vpop.f32.mrb[21].mxu0 }
 0x368   : > { %v1164_v7 = vpop.f32.mrb[22].mxu0  ;;  %v1189_v21 = vld [vmem:[#allocation2] sm:$0xff] (!%p2141_p10) }
 0x369   : > { %1182 = vst [vmem:[#allocation2 + $0x10] sm:$0xff] %v1177_v8  ;;  %v1178_v19 = vadd.f32 %v1164_v7, %v1106_v1  ;;  %v2377_v10 = vpop.f32.mrb[23].mxu0  ;;  %v1230_v50 = vmul.f32 (!%p2141_p10), %v1213_v32, %v1189_v21  ;;  %2417 = vmatpush3.bf16.msra.mxu1 (!%p2141_p10), %v2713_v37  ;;  %v2727_v37 = vld [vmem:[#allocation4 + $0x120] sm:$0xff] (!%p2141_p10)  }
 0x36a   : > { %v1190_v45 = vld [vmem:[#allocation2 + $0x8] sm:$0xff] (!%p2141_p10)  ;;  %2418 = vmatprep.subr.bf16.mxu1 (!%p2141_p10), %v2714_v29 }
 0x36b   : > { %1183 = vst [vmem:[#allocation2 + $0x18] sm:$0xff] %v1178_v19  ;;  %v1231_v54 = vmul.f32 (!%p2141_p10), %v1218_v49, %v1190_v45 }
 0x36d   : > { %v1242_v51 = vpack.c.bf16 %v1231_v54, %v1230_v50  ;;  %2419 = vmatpush3.bf16.msra.mxu1 %v2714_v29  ;;  %v2718_v54 = vld [vmem:[#allocation4 + $0x140] sm:$0xff]   ;;  %v2728_v29 = vld [vmem:[#allocation4 + $0x168] sm:$0xff]  }
 0x36e   : > { %2420 = vmatprep.subr.bf16.mxu1 %v2715_v56 }
 0x36f   : > { %2398 = vmatprep.mubr.bf16.mxu0 %v1242_v51  ;;  %v2720_v51 = vld [vmem:[#allocation4 + $0x148] sm:$0xff]  }
 0x370   : > { %v1191_v53 = vld [vmem:[#allocation2 + $0x10] sm:$0xff] }
 0x371   : > { %v1232_v47 = vmul.f32 %v1223_v30, %v1191_v53  ;;  %2421 = vmatpush3.bf16.msra.mxu1 %v2715_v56  ;;  %v2729_v56 = vld [vmem:[#allocation4 + $0x128] sm:$0xff]  }
 0x372   : > { %v1192_v43 = vld [vmem:[#allocation2 + $0x18] sm:$0xff]  ;;  %2422 = vmatprep.subr.bf16.mxu1 %v2716_v57 }
 0x373   : > { %v1233_v34 = vmul.f32 %v1228_v63, %v1192_v43 }
 0x375   : > { %v1243_v44 = vpack.c.bf16 %v1233_v34, %v1232_v47  ;;  %2423 = vmatpush3.bf16.msra.mxu1 %v2716_v57  ;;  %v2730_v57 = vld [vmem:[#allocation4 + $0x170] sm:$0xff]  }
 0x376   : > { %2424 = vmatprep.subr.bf16.mxu1 %v2717_v41 }
 0x377   : > { %2399 = vmatmul.mubr.bf16.vlgmr.msra.gmra.mrb[0].mxu0 %v1243_v44  ;;  %v2719_v44 = vld [vmem:[#allocation4 + $0x100] sm:$0xff]  }
 0x378   : > { %2403 = vmatpush3.bf16.msra.mxu0 %v2706_v6  ;;  %2406 = vmatprep.mubr.msk.bf16.mxu0 %vm1379_vm1, %v2708_v52  ;;  %v2721_v52 = vld [vmem:[#allocation4 + $0x108] sm:$0xff]  }
 0x379   : > { %2404 = vmatprep.subr.bf16.mxu0 %v2707_v33  ;;  %2425 = vmatpush3.bf16.msra.mxu1 %v2717_v41  ;;  %v2731_v41 = vld [vmem:[#allocation4 + $0x130] sm:$0xff]  }
 0x37a   : > { %2263 = vmatprep.subr.bf16.mxu1 %v2718_v54 }
 0x37c   : > { %2405 = vmatpush3.bf16.msra.mxu0 %v2707_v33  ;;  %v2722_v33 = vld [vmem:[#allocation4 + $0x150] sm:$0xff]  }
 0x383   : > { %2407 = vmatmul.mubr.msk.bf16.vlgmr.msra.gmra.mrb[0].mxu0 %vm1379_vm1, %v2709_v18  ;;  %v2723_v18 = vld [vmem:[#allocation4 + $0x110] sm:$0xff]  }
 0x456   : > { %v2408_v60 = vpop.f32.mrb[0].mxu0 }
 0x457   : > { %v1441_v62 = vadd.f32 %v2408_v60, %v1438_v46  ;;  %v1420_v48 = vpop.f32.mrb[1].mxu0  ;;  %v1499_v60 = vsub.s32 3, %v3121_v24 }
 0x458   : > { %v1439_v2 = vadd.f32 %v1438_v46, %v1420_v48  ;;  %v2409_v55 = vpop.f32.mrb[2].mxu0 }
 0x459   : > { %v1449_v25 = vand.u32 2147483647, %v1441_v62  ;;  %v1442_v0 = vadd.f32 %v2409_v55, %v1438_v46  ;;  %v1423_v1 = vpop.f32.mrb[3].mxu0  ;;  %v1445_v6 = vmax.f32 %v1441_v62, 0.0  ;;  %v1500_v62 = vrot.slane %v3129_v26, %v1499_v60  ;;  %v2736_v60 = vld [vmem:[#allocation4 + $0x190] sm:$0xff]  }
 0x45a   : > { %v1447_v8 = vand.u32 2147483647, %v1439_v2  ;;  %v1440_v4 = vadd.f32 %v1438_v46, %v1423_v1  ;;  %v1443_v53 = vmax.f32 %v1439_v2, 0.0  ;;  %v2733_v46 = vld [vmem:[#allocation4 + $0x138] sm:$0xff]  }
 0x45b   : > { %v1453_v7 = vsub.f32 0.0, %v1449_v25  ;;  %v1450_v19 = vand.u32 2147483647, %v1442_v0  ;;  %v1446_v30 = vmax.f32 %v1442_v0, 0.0 }
 0x45c   : > { %v1451_v10 = vsub.f32 0.0, %v1447_v8  ;;  %v1448_v61 = vand.u32 2147483647, %v1440_v4  ;;  %v1444_v43 = vmax.f32 %v1440_v4, 0.0 }
 0x45d   : > { %v1459_v27 = vmul.f32 1.442695, %v1453_v7  ;;  %v1454_v12 = vsub.f32 0.0, %v1450_v19 }
 0x45e   : > { %v1455_v13 = vmul.f32 1.442695, %v1451_v10  ;;  %v1452_v15 = vsub.f32 0.0, %v1448_v61 }
 0x45f   : > { %2750 = vpow2.f32 %v1459_v27  ;;  %v1461_v58 = vmul.f32 1.442695, %v1454_v12 }
 0x460   : > { %2752 = vpow2.f32 %v1455_v13  ;;  %v1457_v16 = vmul.f32 1.442695, %v1452_v15 }
 0x461   : > { %2754 = vpow2.f32 %v1461_v58 }
 0x462   : > { %2756 = vpow2.f32 %v1457_v16 }
 0x469   : > { %v2751_v17 = vpop.eup %2750 }
 0x46a   : > { %v2753_v20 = vpop.eup %2752  ;;  %v1465_v28 = vadd.f32 1.0, %v2751_v17 }
 0x46b   : > { %v2755_v14 = vpop.eup %2754  ;;  %v1463_v3 = vadd.f32 1.0, %v2753_v20 }
 0x46c   : > { %v2757_v11 = vpop.eup %2756  ;;  %2758 = vlog2.f32 %v1465_v28  ;;  %v1466_v22 = vadd.f32 1.0, %v2755_v14 }
 0x46d   : > { %v1464_v31 = vadd.f32 1.0, %v2757_v11  ;;  %2760 = vlog2.f32 %v1463_v3 }
 0x46e   : > { %2762 = vlog2.f32 %v1466_v22 }
 0x46f   : > { %2764 = vlog2.f32 %v1464_v31 }
 0x476   : > { %v2759_v42 = vpop.eup %2758 }
 0x477   : > { %v2761_v9 = vpop.eup %2760  ;;  %v1472_v35 = vmul.f32 0.6931472, %v2759_v42 }
 0x478   : > { %v2763_v38 = vpop.eup %2762  ;;  %v1468_v23 = vmul.f32 0.6931472, %v2761_v9 }
 0x479   : > { %v2765_v40 = vpop.eup %2764  ;;  %v1474_v32 = vmul.f32 0.6931472, %v2763_v38  ;;  %v1477_v45 = vadd.f32 %v1472_v35, %v1445_v6 }
 0x47a   : > { %v1470_v21 = vmul.f32 0.6931472, %v2765_v40  ;;  %v1475_v47 = vadd.f32 %v1468_v23, %v1443_v53 }
 0x47b   : > { %v1478_v63 = vadd.f32 %v1474_v32, %v1446_v30 }
 0x47c   : > { %v1476_v34 = vadd.f32 %v1470_v21, %v1444_v43 }
 0x47d   : > { %v1480_v49 = vpack.c.bf16 %v1478_v63, %v1477_v45 }
 0x47e   : > { %v1479_v50 = vpack.c.bf16 %v1476_v34, %v1475_v47 }
 0x480   : > { %2426 = vmatprep.mubr.bf16.mxu1 %v1479_v50 }
 0x481   : > { %2427 = vmatmul.mubr.bf16.vlgmr.msra.gmra.mrb[0].mxu1 %v1480_v49 }
 0x482   : > { %2264 = vmatpush3.bf16.msra.mxu1 %v2719_v44 }
 0x483   : > { %2265 = vmatprep.subr.bf16.mxu1 %v2720_v51 }
 0x486   : > { %2266 = vmatpush3.bf16.msra.mxu1 %v2721_v52 }
 0x487   : > { %2267 = vmatprep.subr.bf16.mxu1 %v2722_v33 }
 0x48a   : > { %2268 = vmatpush3.bf16.msra.mxu1 %v2723_v18 }
 0x48b   : > { %2269 = vmatprep.subr.bf16.mxu1 %v2724_v36  ;;  %v1193_v36 = vld [vmem:[#allocation2 + $0x20] sm:$0xff] }
 0x48e   : > { %2270 = vmatpush3.bf16.msra.mxu1 %v2725_v5 }
 0x48f   : > { %2271 = vmatprep.subr.bf16.mxu1 %v2726_v39  ;;  %v1638_v39 = vmul.f32 0.00390625, %v1193_v36 }
 0x492   : > { %2272 = vmatpush3.bf16.msra.mxu1 %v2727_v37 }
 0x493   : > { %2273 = vmatprep.subr.bf16.mxu1 %v2728_v29 }
 0x496   : > { %2274 = vmatpush3.bf16.msra.mxu1 %v2729_v56  ;;  %v1649_v56 = vpack.c.bf16 %v1638_v39, %v1638_v39 }
 0x497   : > { %2275 = vmatprep.subr.bf16.mxu1 %v2730_v57 }
 0x49a   : > { %2276 = vmatpush3.bf16.msra.mxu1 %v2731_v41  ;;  %v2734_v41 = vld [vmem:[#allocation4 + $0x180] sm:$0xff]  }
 0x49b   : > { %2277 = vmatprep.subr.bf16.mxu1 %v2732_v59  ;;  %v2951_v59 = vmov 0.0  }
 0x49c   : > { %2430 = vmatprep.subr.bf16.mxu0 %v2951_v59  ;;  %2446 = vmatprep.mubr.msk.bf16.mxu0 %vm2952_vm2, %v2951_v59 }
 0x49d   : > { %2431 = vmatpush3.bf16.msra.mxu0 %v2734_v41 }
 0x49e   : > { %2278 = vmatpush3.bf16.msra.mxu1 %v2733_v46  ;;  %2432 = vmatprep.subr.bf16.mxu0 %v2951_v59  ;;  %v2735_v46 = vld [vmem:[#allocation4 + $0x188] sm:$0xff]  }
 0x4a1   : > { %2433 = vmatpush3.bf16.msra.mxu0 %v2735_v46 }
 0x4a2   : > { %2434 = vmatprep.subr.bf16.mxu0 %v2951_v59 }
 0x4a5   : > { %2435 = vmatpush3.bf16.msra.mxu0 %v2736_v60 }
 0x4a6   : > { %2436 = vmatprep.subr.bf16.mxu0 %v2951_v59 }
 0x554   : > { %v2428_v48 = vpop.f32.mrb[0].mxu1 }
 0x555   : > { %v1592_v2 = vadd.f32 %v2428_v48, %v1500_v62  ;;  %v1583_v55 = vpop.f32.mrb[1].mxu1  ;;  %v2738_v48 = vld [vmem:[#allocation4 + $0x1a0] sm:$0xff]  }
 0x556   : > { %v1584_v25 = vadd.f32 %v1583_v55, %v1500_v62  ;;  %v2429_v0 = vpop.f32.mrb[2].mxu1  ;;  %v2740_v55 = vld [vmem:[#allocation4 + $0x1b0] sm:$0xff]  }
 0x557   : > { %v1604_v1 = vand.u32 2147483647, %v1592_v2  ;;  %v1595_v8 = vadd.f32 %v2429_v0, %v1500_v62  ;;  %v1586_v4 = vpop.f32.mrb[3].mxu1  ;;  %v1600_v38 = vmax.f32 %v1592_v2, 0.0  ;;  %v2739_v2 = vld [vmem:[#allocation4 + $0x1a8] sm:$0xff]  }
 0x558   : > { %v1602_v7 = vand.u32 2147483647, %v1584_v25  ;;  %v1587_v19 = vadd.f32 %v1586_v4, %v1500_v62  ;;  %v1598_v6 = vmax.f32 %v1584_v25, 0.0  ;;  %v2737_v62 = vld [vmem:[#allocation4 + $0x198] sm:$0xff]  }
 0x559   : > { %v1608_v10 = vsub.f32 0.0, %v1604_v1  ;;  %v1605_v61 = vand.u32 2147483647, %v1595_v8  ;;  %v1601_v43 = vmax.f32 %v1595_v8, 0.0  ;;  %2437 = vmatpush3.bf16.msra.mxu0 %v2737_v62  ;;  %v2741_v25 = vld [vmem:[#allocation4 + $0x1b8] sm:$0xff]   ;;  %v1780_v1 = vrot.slane %v3129_v26, 4 }
 0x55a   : > { %v1606_v27 = vsub.f32 0.0, %v1602_v7  ;;  %v1603_v12 = vand.u32 2147483647, %v1587_v19  ;;  %v1599_v63 = vmax.f32 %v1587_v19, 0.0  ;;  %2438 = vmatprep.subr.bf16.mxu0 %v2951_v59 }
 0x55b   : > { %v1614_v13 = vmul.f32 1.442695, %v1608_v10  ;;  %v1609_v15 = vsub.f32 0.0, %v1605_v61 }
 0x55c   : > { %v1610_v58 = vmul.f32 1.442695, %v1606_v27  ;;  %v1607_v24 = vsub.f32 0.0, %v1603_v12 }
 0x55d   : > { %2766 = vpow2.f32 %v1614_v13  ;;  %v1616_v16 = vmul.f32 1.442695, %v1609_v15  ;;  %2439 = vmatpush3.bf16.msra.mxu0 %v2738_v48 }
 0x55e   : > { %2768 = vpow2.f32 %v1610_v58  ;;  %v1612_v17 = vmul.f32 1.442695, %v1607_v24  ;;  %2440 = vmatprep.subr.bf16.mxu0 %v2951_v59 }
 0x55f   : > { %2770 = vpow2.f32 %v1616_v16 }
 0x560   : > { %2772 = vpow2.f32 %v1612_v17 }
 0x561   : > { %2441 = vmatpush3.bf16.msra.mxu0 %v2739_v2 }
 0x562   : > { %2442 = vmatprep.subr.bf16.mxu0 %v2951_v59 }
 0x565   : > { %2443 = vmatpush3.bf16.msra.mxu0 %v2740_v55 }
 0x566   : > { %2444 = vmatprep.subr.bf16.mxu0 %v2951_v59 }
 0x567   : > { %v2767_v20 = vpop.eup %2766 }
 0x568   : > { %v2769_v28 = vpop.eup %2768  ;;  %v1620_v14 = vadd.f32 1.0, %v2767_v20 }
 0x569   : > { %v2771_v3 = vpop.eup %2770  ;;  %v1618_v11 = vadd.f32 1.0, %v2769_v28  ;;  %2445 = vmatpush3.bf16.msra.mxu0 %v2741_v25  ;;  %v1896_v28 = vrot.slane %v3129_v26, 5 }
 0x56a   : > { %v2773_v22 = vpop.eup %2772  ;;  %2774 = vlog2.f32 %v1620_v14  ;;  %v1621_v31 = vadd.f32 1.0, %v2771_v3 }
 0x56b   : > { %2776 = vlog2.f32 %v1618_v11  ;;  %v1619_v42 = vadd.f32 1.0, %v2773_v22 }
 0x56c   : > { %2778 = vlog2.f32 %v1621_v31 }
 0x56d   : > { %2780 = vlog2.f32 %v1619_v42 }
 0x574   : > { %v2775_v9 = vpop.eup %2774 }
 0x575   : > { %v2777_v35 = vpop.eup %2776  ;;  %v1627_v23 = vmul.f32 0.6931472, %v2775_v9 }
 0x576   : > { %v2779_v40 = vpop.eup %2778  ;;  %v1623_v30 = vmul.f32 0.6931472, %v2777_v35 }
 0x577   : > { %v2781_v32 = vpop.eup %2780  ;;  %v1632_v53 = vadd.f32 %v1627_v23, %v1600_v38  ;;  %v1629_v21 = vmul.f32 0.6931472, %v2779_v40 }
 0x578   : > { %v1630_v45 = vadd.f32 %v1623_v30, %v1598_v6  ;;  %v1625_v47 = vmul.f32 0.6931472, %v2781_v32 }
 0x579   : > { %1636 = vst [vmem:[#allocation8 + $0x10] sm:$0xff] %v1632_v53  ;;  %v1633_v34 = vadd.f32 %v1629_v21, %v1601_v43 }
 0x57a   : > { %1634 = vst [vmem:[#allocation8] sm:$0xff] %v1630_v45  ;;  %v1631_v49 = vadd.f32 %v1625_v47, %v1599_v63 }
 0x57b   : > { %1637 = vst [vmem:[#allocation8 + $0x18] sm:$0xff] %v1633_v34 }
 0x57c   : > { %1635 = vst [vmem:[#allocation8 + $0x8] sm:$0xff] %v1631_v49  ;;  %v1639_v50 = vadd.f32 %v1631_v49, %v1630_v45 }
 0x57e   : > { %v1640_v54 = vadd.f32 %v1639_v50, %v1632_v53 }
 0x580   : > { %v1641_v44 = vadd.f32 %v1640_v54, %v1633_v34 }
 0x582   : > { %v1642_v51 = vrot.slane %v1641_v44, 4 }
 0x584   : > { %v1643_v52 = vadd.f32 %v1642_v51, %v1641_v44 }
 0x586   : > { %v1644_v33 = vrot.slane %v1643_v52, 2 }
 0x588   : > { %v1645_v18 = vadd.f32 %v1644_v33, %v1643_v52 }
 0x58a   : > { %v1646_v5 = vrot.slane %v1645_v18, 1 }
 0x58c   : > { %v1647_v37 = vadd.f32 %v1646_v5, %v1645_v18 }
 0x58e   : > { %v1648_v29 = vmul.f32 0.03125, %v1647_v37 }
 0x590   : > { %v1650_v57 = vpack.c.bf16 %v1648_v29, %v1648_v29 }
 0x592   : > { %1814 = vmatprep.mubr.bf16.mxu1 %v1650_v57 }
 0x593   : > { %1815 = vmatmul.mubr.bf16.vlgmr.msra.gmra.mrb[4].mxu1 %v1649_v56 }
 0x666   : > { %v2279_v0 = vpop.f32.mrb[4].mxu1 }
 0x667   : > { %v2280_v8 = vpop.f32.mrb[5].mxu1 }
 0x668   : > { %v2281_v4 = vadd.f32 %v2280_v8, %v2279_v0  ;;  %v2282_v7 = vpop.f32.mrb[6].mxu1 }
 0x669   : > { %v2283_v19 = vpop.f32.mrb[7].mxu1 }
 0x66a   : > { %v1817_v10 = vadd.f32 %v2281_v4, %v1780_v1 }
 0x66c   : > { %v1823_v61 = vand.u32 2147483647, %v1817_v10  ;;  %v1822_v24 = vmax.f32 %v1817_v10, 0.0 }
 0x66e   : > { %v1824_v27 = vsub.f32 0.0, %v1823_v61 }
 0x670   : > { %v1825_v12 = vmul.f32 1.442695, %v1824_v27 }
 0x672   : > { %2782 = vpow2.f32 %v1825_v12 }
 0x67c   : > { %v2783_v13 = vpop.eup %2782 }
 0x67d   : > { %v1827_v15 = vadd.f32 1.0, %v2783_v13 }
 0x67f   : > { %2784 = vlog2.f32 %v1827_v15 }
 0x689   : > { %v2785_v58 = vpop.eup %2784 }
 0x68a   : > { %v1829_v16 = vmul.f32 0.6931472, %v2785_v58 }
 0x68c   : > { %v1830_v17 = vadd.f32 %v1829_v16, %v1822_v24 }
 0x68e   : > { %v1831_v20 = vpack.c.bf16 %v1830_v17, %v1830_v17 }
 0x690   : > { %2447 = vmatmul.mubr.bf16.vlgmr.msra.gmra.mrb[4].mxu0 %v1831_v20 }
 0x763   : > { %v1932_v14 = vpop.f32.mrb[4].mxu0 }
 0x764   : > { %v1933_v3 = vadd.f32 %v1932_v14, %v1896_v28  ;;  %v2448_v11 = vpop.f32.mrb[5].mxu0 }
 0x765   : > { %v1935_v22 = vpop.f32.mrb[6].mxu0 }
 0x766   : > { %v1939_v31 = vand.u32 2147483647, %v1933_v3  ;;  %v2449_v42 = vpop.f32.mrb[7].mxu0  ;;  %v1938_v6 = vmax.f32 %v1933_v3, 0.0 }
 0x768   : > { %v1940_v9 = vsub.f32 0.0, %v1939_v31 }
 0x76a   : > { %v1941_v35 = vmul.f32 1.442695, %v1940_v9 }
 0x76c   : > { %2786 = vpow2.f32 %v1941_v35 }
 0x776   : > { %v2787_v38 = vpop.eup %2786 }
 0x777   : > { %v1943_v23 = vadd.f32 1.0, %v2787_v38 }
 0x779   : > { %2788 = vlog2.f32 %v1943_v23 }
 0x783   : > { %v2789_v40 = vpop.eup %2788 }
 0x784   : > { %v1945_v30 = vmul.f32 0.6931472, %v2789_v40 }
 0x786   : > { %v1946_v32 = vadd.f32 %v1945_v30, %v1938_v6 }
 0x788   : > { %1947 = vst [vmem:[#allocation10] sm:$0x1] %v1946_v32 }
 0x789 PF: > { %s2953_s22 = smov [#allocation8]   ;;  %s2197_s29 = sshll.u32 %s3019_s28, 11 }
 0x78a   : > { %s1975_s23 = sshll.u32 %s2953_s22, 4  ;;  %s3418_s17 = scalar_lea.hbm %s3520_s5, %s2197_s29  ;;  %s1976_s23 = int_to_ptr.vmem [resolvable:$true] %s1975_s23 }
 0x78b   : > { %s2818_s16 = scalar_lea.vmem %s1976_s23, 512  ;;  %p3541_p13 = scmp.eq.s32.totalorder %s3019_s28, 1 }
 0x78c   : > { %p2819_p11 = scmp.ne.s32.totalorder %s1976_s23, %s2818_s16  ;;  %p2825_p7 = scmp.lt.s32.totalorder %s1976_s23, %s1976_s23 }
 0x78d   : > { %p2826_p8 = scmp.lt.s32.totalorder %s2818_s16, %s2818_s16 }
 0x78e   : > { %p2820_p1 = pnand %p2819_p11, %p3541_p13 }
 0x78f   : > { %p2827_p12 = por %p2826_p8, %p2825_p7 }
 0x790   : > { %p2821_p4 = pneg %p2820_p1 }
 0x792   : > { %p2828_p0 = pnand %p2827_p12, %p2821_p4 }
 0x794   : > { %2831 = shalt.err (!%p2828_p0)
}
 0x795   : > { %s2832_s15 = scalar_lea.hbm %s3521_s6, 512  ;;  %p3542_p2 = pmov %p3541_p13 }
 0x796   : > { %p2833_p3 = scmp.ne.s32.totalorder %s3521_s6, %s2832_s15  ;;  %p2838_p9 = scmp.lt.u32.totalorder %s2832_s15, %s3521_s6 }
 0x798   : > { %p2834_p5 = pnand %p2833_p3, %p3542_p2 }
 0x79a   : > { %p2835_p6 = pneg %p2834_p5 }
 0x79c   : > { %p2840_p10 = pnand %p2838_p9, %p2835_p6 }
 0x79e   : > { %2843 = shalt.err (!%p2840_p10)
}
 0x79f   : > { %s2954_s8 = smov 128   ;;  %s2955_s14 = smov 8  }
 0x7a0   : > { %p3543_p11 = pmov %p3542_p2  ;;  %s1962_s13 = sshll.u32 %s3101_s9, 4  ;;  %s3442_s13 = int_to_ptr.vmem [resolvable:$true] %s1962_s13 }
 0x7a1   : > { %s2956_s15 = smov [#allocation10]   ;;  %s3448_s21 = scalar_lea.sflag [#allocation6], %s288_s18 }
 0x7a2   : > { %2476 = dma.vmem_to_hbm [thread:$0]  (%p3543_p11), %s1976_s23, 512, %s3521_s6, [#allocation9], %s2954_s8, %s2954_s8, %s2955_s14  }
 0x7a3   : > { %s3444_s20 = sshll.u32 %s2956_s15, 4  ;;  %s2844_s22 = scalar_lea.vmem %s3442_s13, 2048  ;;  %s1990_s20 = int_to_ptr.vmem [resolvable:$true] %s3444_s20 }
 0x7a4   : > { %p2845_p13 = scmp.ne.s32.totalorder %s3442_s13, %s2844_s22  ;;  %p3544_p1 = scmp.ne.s32.totalorder %s3527_s11, 0 }
 0x7a5   : > { %s2957_s29 = smov [#allocation7]  }
 0x7a6   : > { %p2846_p4 = pnand %p2845_p13, %p3544_p1  ;;  %s2848_s16 = sshll.u32 %s2957_s29, 4  ;;  %s2849_s16 = int_to_ptr.vmem [resolvable:$false] %s2848_s16 }
 0x7a7   : > { %s2850_s9 = scalar_lea.vmem %s2849_s16, 4096  ;;  %p2851_p8 = scmp.lt.s32.totalorder %s3442_s13, %s2849_s16 }
 0x7a8   : > { %p2847_p7 = pneg %p2846_p4  ;;  %p2852_p12 = scmp.lt.s32.totalorder %s2850_s9, %s2844_s22 }
 0x7aa   : > { %p2853_p0 = por %p2852_p12, %p2851_p8 }
 0x7ac   : > { %p2854_p3 = pnand %p2853_p0, %p2847_p7 }
 0x7ae   : > { %2857 = shalt.err (!%p2854_p3)
}
 0x7af   : > { %s2858_s18 = scalar_lea.hbm %s3418_s17, 2048  ;;  %s2862_s15 = scalar_lea.hbm %s3520_s5, 4096 }
 0x7b0   : > { %p2859_p2 = scmp.ne.s32.totalorder %s3418_s17, %s2858_s18  ;;  %p2863_p9 = scmp.lt.u32.totalorder %s3418_s17, %s3520_s5 }
 0x7b1   : > { %p2864_p10 = scmp.lt.u32.totalorder %s2862_s15, %s2858_s18  ;;  %p2866_p13 = scmp.lt.u32.totalorder %s2858_s18, %s3418_s17 }
 0x7b2   : > { %p2860_p5 = pnand %p2859_p2, %p3544_p1 }
 0x7b3   : > { %p2865_p11 = por %p2864_p10, %p2863_p9 }
 0x7b4   : > { %p2861_p6 = pneg %p2860_p5 }
 0x7b5   : > { %p2867_p4 = por %p2866_p13, %p2865_p11 }
 0x7b7   : > { %p2868_p7 = pnand %p2867_p4, %p2861_p6 }
 0x7b9   : > { %2871 = shalt.err (!%p2868_p7)
}
 0x7ba   : > { %2474 = dma.vmem_to_hbm [thread:$0]  (%p3544_p1), %s3442_s13, 2048, %s3418_s17, %s3448_s21, %s2954_s8, %s2954_s8, %s2955_s14  }
 0x7bb   : > { %s2872_s22 = scalar_lea.vmem %s1990_s20, 16  ;;  %p3545_p12 = scmp.eq.s32.totalorder %s3019_s28, 1 }
 0x7bc   : > { %p2873_p8 = scmp.ne.s32.totalorder %s1990_s20, %s2872_s22  ;;  %s2878_s9 = scalar_lea.vmem %s1990_s20, 32 }
 0x7bd   : > { %p2879_p2 = scmp.lt.s32.totalorder %s1990_s20, %s1990_s20  ;;  %p2880_p5 = scmp.lt.s32.totalorder %s2878_s9, %s2872_s22 }
 0x7be   : > { %p2874_p0 = pnand %p2873_p8, %p3545_p12 }
 0x7bf   : > { %p2881_p6 = por %p2880_p5, %p2879_p2 }
 0x7c0   : > { %p2875_p3 = pneg %p2874_p0 }
 0x7c2   : > { %p2882_p9 = pnand %p2881_p6, %p2875_p3 }
 0x7c4   : > { %2885 = shalt.err (!%p2882_p9)
}
 0x7c5   : > { %s2886_s23 = scalar_lea.hbm %s3522_s7, 16  ;;  %p3546_p10 = pmov %p3545_p12 }
 0x7c6   : > { %p2887_p1 = scmp.ne.s32.totalorder %s3522_s7, %s2886_s23  ;;  %p2892_p4 = scmp.lt.u32.totalorder %s2886_s23, %s3522_s7 }
 0x7c8   : > { %p2888_p11 = pnand %p2887_p1, %p3546_p10 }
 0x7ca   : > { %p2889_p13 = pneg %p2888_p11 }
 0x7cc   : > { %p2894_p7 = pnand %p2892_p4, %p2889_p13 }
 0x7ce   : > { %2897 = shalt.err (!%p2894_p7)
}
 0x7cf   : > { %p3547_p8 = pmov %p3546_p10 }
 0x7d1   : > { %2478 = dma.vmem_to_hbm [thread:$0]  (%p3547_p8), %s1990_s20, 16, %s3522_s7, [#allocation9]  }
 0x7d2   : > { %p3548_p12 = pmov %p3547_p8 }
 0x7d3   : > { %p3549_p0 = pmov %p3547_p8 }
 0x7d4   : > { %2919 = dma.done.wait (%p3548_p12), [#allocation9], 528  }
 0x7d5   : > { %2921 = vsyncadd (%p3549_p0), [#allocation9], 4294966768 }
 0x7d6 PF: > { %p2498_p3 = scmp.ge.s32.totalorder %s2940_s27, 2  ;;  %s2009_s21 = sand.u32 1, %s2928_s24  }
 0x7d7   : > { %p3550_p2 = scmp.ne.s32.totalorder %s3528_s12, 0  ;;  %s2010_s29 = scalar_lea.sflag [#allocation6], %s2009_s21 }
 0x7d9   : > { %p2489_p5 = pnand %p2498_p3, %p3550_p2 }
 0x7db   : > { %2923 = dma.done.wait (!%p2489_p5), %s2010_s29, 2048  }
 0x7dc   : > { %2925 = vsyncadd (!%p2489_p5), %s2010_s29, 4294965248  ;;  %p20_p6 = scmp.ge.s32.totalorder %s3023_s30, 4   ;;  %s3551_s24 = smov %s2932_s25 }
 0x7dd   : > { %s3552_s25 = smov %s2936_s26  ;;  %s3553_s26 = smov %s3034_s10 }
 0x7de   : > { %s3554_s27 = smov %s3023_s30  ;;  %22 = sbr.rel (!%p20_p6) target bundleno = 5 (0x5), region = 107 }
 0x7e5   :  { %2015 = vsyncpa [#allocation5], 1 }
 0x7e6   :  { %2017 = vsyncpa [#allocation5 + $0x1], 1 }
 0x7e7   :  { %2018 = vsyncpa [#allocation6], 1 }
 0x7e8   :  { %2020 = vsyncpa [#allocation6 + $0x1], 1 }
 0x7e9   :  { %2021 = vsyncpa [#allocation9], 1 }

</bundles_post_ra>
